<compile_context>
chip_gen: v5e
topology: v5e:2x2
jax: 0.10.0
libtpu: 0.0.40
codegen_flags: <defaults>
</compile_context>

<pallas_src>
import jax
import jax.numpy as jnp
from jax import lax
from jax.experimental import pallas as pl
from jax.experimental.pallas import tpu as pltpu


# ---------------------------------------------------------------------------
# Pallas kernels
# ---------------------------------------------------------------------------
def _conv_relu_pool_kernel(x_ref, w_ref, b_ref, o_ref):
    """Fused im2col-GEMM + bias + ReLU + 2x2 max-pool.

    x_ref: (4, M, K)   im2col rows; leading axis enumerates the (dh, dw)
                       position inside each 2x2 max-pool window, M = pooled
                       output positions, K = kh*kw*Cin reduction dim.
    w_ref: (K, Cout)   conv weights reshaped (kh, kw, ci) -> co.
    b_ref: (1, Cout)   bias.
    o_ref: (M, Cout)   pooled NHWC rows (ohp, owp major order).
    """
    w = w_ref[...]
    b = b_ref[...]

    def win(i):
        acc = jnp.dot(x_ref[i], w, preferred_element_type=jnp.float32)
        return jnp.maximum(acc + b, 0.0)

    pooled = jnp.maximum(jnp.maximum(win(0), win(1)),
                         jnp.maximum(win(2), win(3)))
    o_ref[...] = pooled.astype(o_ref.dtype)


def _fc_stack_kernel(x_ref, w1_ref, b1_ref, w2_ref, b2_ref, w3_ref, b3_ref,
                     o_ref):
    """Fused fc1 -> relu -> fc2 -> relu -> fc3; all operands resident in VMEM."""
    h = jnp.dot(x_ref[...], w1_ref[...],
                preferred_element_type=jnp.float32) + b1_ref[...]
    h = jnp.maximum(h, 0.0)
    h = jnp.dot(h, w2_ref[...],
                preferred_element_type=jnp.float32) + b2_ref[...]
    h = jnp.maximum(h, 0.0)
    o = jnp.dot(h, w3_ref[...],
                preferred_element_type=jnp.float32) + b3_ref[...]
    o_ref[...] = o.astype(o_ref.dtype)


# ---------------------------------------------------------------------------
# Wrappers
# ---------------------------------------------------------------------------
def _im2col_pool_windows(x, k):
    """x: (N, H, W, C) NHWC -> (N, 4, OHp*OWp, k*k*C).

    Axis 1 enumerates the (dh, dw) position inside each 2x2 pooling window,
    axis 2 the pooled output positions (ohp, owp), axis 3 the GEMM reduction
    dim ordered (kh, kw, ci) to match the OIHW -> (kh, kw, ci, co) weight
    reshape.  This is plain-JAX glue that XLA fuses into one materialization;
    the matmul/bias/relu/pool hot path runs in the Pallas kernel.
    """
    n, h, w, c = x.shape
    oh, ow = h - k + 1, w - k + 1            # conv output (even for this net)
    ohp, owp = oh // 2, ow // 2
    cols = []
    for kh in range(k):
        for kw in range(k):
            cols.append(x[:, kh:kh + oh, kw:kw + ow, :])       # (N, OH, OW, C)
    p = jnp.stack(cols, axis=3)                                # (N, OH, OW, k*k, C)
    p = p.reshape(n, ohp, 2, owp, 2, k * k * c)
    p = p.transpose(0, 2, 4, 1, 3, 5)                          # (N, 2, 2, OHp, OWp, K)
    return p.reshape(n, 4, ohp * owp, k * k * c), (n, ohp, owp)


def conv_relu_pool(x_nhwc, w_oihw, b, *, k):
    """maxpool2x2(relu(conv2d(x, w) + b)) with NHWC activations, one kernel."""
    cout, cin = w_oihw.shape[0], w_oihw.shape[1]
    cols, (n, ohp, owp) = _im2col_pool_windows(x_nhwc, k)
    m = ohp * owp
    kk = k * k * cin
    w2d = w_oihw.transpose(2, 3, 1, 0).reshape(kk, cout)       # (kh,kw,ci) -> co
    out = pl.pallas_call(
        _conv_relu_pool_kernel,
        out_shape=jax.ShapeDtypeStruct((n, m, cout), jnp.float32),
        grid=(n,),
        in_specs=[
            pl.BlockSpec((None, 4, m, kk), lambda i: (i, 0, 0, 0)),
            pl.BlockSpec((kk, cout), lambda i: (0, 0)),
            pl.BlockSpec((1, cout), lambda i: (0, 0)),
        ],
        out_specs=pl.BlockSpec((None, m, cout), lambda i: (i, 0, 0)),
        compiler_params=pltpu.CompilerParams(dimension_semantics=("parallel",)),
    )(cols, w2d, b.reshape(1, cout))
    return out.reshape(n, ohp, owp, cout)


def fc_stack(x, p):
    """fc3(relu(fc2(relu(fc1(x))))) fused into a single Pallas call."""
    n = x.shape[0]
    n_out = p["fc3_b"].shape[0]
    vmem_specs = [pl.BlockSpec(memory_space=pltpu.MemorySpace.VMEM)
                  for _ in range(7)]
    return pl.pallas_call(
        _fc_stack_kernel,
        out_shape=jax.ShapeDtypeStruct((n, n_out), jnp.float32),
        in_specs=vmem_specs,
        out_specs=pl.BlockSpec(memory_space=pltpu.MemorySpace.VMEM),
    )(x,
      p["fc1_w"].T, p["fc1_b"].reshape(1, -1),
      p["fc2_w"].T, p["fc2_b"].reshape(1, -1),
      p["fc3_w"].T, p["fc3_b"].reshape(1, -1))


# ---------------------------------------------------------------------------
# Parameters / forward / reference
# ---------------------------------------------------------------------------
def init_params(key):
    """Deterministic synthetic parameters, PyTorch-convention shapes/dtypes."""
    def uni(k, shape, fan_in):
        bound = 1.0 / jnp.sqrt(jnp.float32(fan_in))
        return jax.random.uniform(k, shape, jnp.float32, -bound, bound)
    ks = jax.random.split(key, 10)
    return {
        "conv1_w": uni(ks[0], (6, 3, 5, 5), 3 * 5 * 5),   # OIHW
        "conv1_b": uni(ks[1], (6,), 3 * 5 * 5),
        "conv2_w": uni(ks[2], (16, 6, 5, 5), 6 * 5 * 5),  # OIHW
        "conv2_b": uni(ks[3], (16,), 6 * 5 * 5),
        "fc1_w": uni(ks[4], (120, 400), 400),             # (out, in)
        "fc1_b": uni(ks[5], (120,), 400),
        "fc2_w": uni(ks[6], (84, 120), 120),
        "fc2_b": uni(ks[7], (84,), 120),
        "fc3_w": uni(ks[8], (10, 84), 84),
        "fc3_b": uni(ks[9], (10,), 84),
    }


def net_forward(x_nchw, p):
    x = jnp.transpose(x_nchw, (0, 2, 3, 1))                      # NCHW -> NHWC
    y = conv_relu_pool(x, p["conv1_w"], p["conv1_b"], k=5)       # (N, 14, 14, 6)
    y = conv_relu_pool(y, p["conv2_w"], p["conv2_b"], k=5)       # (N,  5,  5, 16)
    # flatten in NCHW order to match torch's x.view(-1, 16*5*5)
    n = y.shape[0]
    y = jnp.transpose(y, (0, 3, 1, 2)).reshape(n, 16 * 5 * 5)    # (N, 400)
    return fc_stack(y, p)                                        # (N, 10)


def reference_forward(x_nchw, p):
    """Pure-JAX reference mirroring the PyTorch forward, for validation."""
    dn = ("NCHW", "OIHW", "NCHW")
    y = lax.conv_general_dilated(x_nchw, p["conv1_w"], (1, 1), "VALID",
                                 dimension_numbers=dn)
    y = jnp.maximum(y + p["conv1_b"][None, :, None, None], 0.0)
    y = lax.reduce_window(y, -jnp.inf, lax.max, (1, 1, 2, 2), (1, 1, 2, 2), "VALID")
    y = lax.conv_general_dilated(y, p["conv2_w"], (1, 1), "VALID",
                                 dimension_numbers=dn)
    y = jnp.maximum(y + p["conv2_b"][None, :, None, None], 0.0)
    y = lax.reduce_window(y, -jnp.inf, lax.max, (1, 1, 2, 2), (1, 1, 2, 2), "VALID")
    y = y.reshape(y.shape[0], -1)
    y = jnp.maximum(y @ p["fc1_w"].T + p["fc1_b"], 0.0)
    y = jnp.maximum(y @ p["fc2_w"].T + p["fc2_b"], 0.0)
    return y @ p["fc3_w"].T + p["fc3_b"]


if __name__ == "__main__":
    key = jax.random.PRNGKey(0)
    k_x, k_p = jax.random.split(key)
    # CIFAR-sized input: batch=2, NCHW (3, 32, 32) is forced by the 16*5*5 flatten.
    x = jax.random.normal(k_x, (2, 3, 32, 32), jnp.float32)
    params = init_params(k_p)

    out = jax.jit(net_forward)(x, params)
    out = jax.block_until_ready(out)
    assert out.shape == (2, 10)

    ref = reference_forward(x, params)
    assert jnp.allclose(out, ref, rtol=1e-2, atol=1e-2), "Pallas output mismatch"

    print("KERNEL_OK")
</pallas_src>

<mosaic_0001>
module attributes {stable_mosaic.version = 11 : i64} {
  func.func @_conv_relu_pool_kernel(%arg0: i32, %arg1: memref<1x4x196x75xf32, #tpu.memory_space<vmem>>, %arg2: memref<75x6xf32, #tpu.memory_space<vmem>>, %arg3: memref<1x6xf32, #tpu.memory_space<vmem>>, %arg4: memref<1x196x6xf32, #tpu.memory_space<vmem>>) attributes {dimension_semantics = [#tpu.dimension_semantics<parallel>], iteration_bounds = array<i64: 2>, scalar_prefetch = 0 : i64, scratch_operands = 0 : i64, tpu.core_type = #tpu.core_type<tc>, window_params = [{transform_indices = @transform_0, window_bounds = array<i64: 1, 4, 196, 75>}, {pipeline_mode = #tpu.pipeline_mode<synchronous>, transform_indices = @transform_1, window_bounds = array<i64: 75, 6>}, {pipeline_mode = #tpu.pipeline_mode<synchronous>, transform_indices = @transform_2, window_bounds = array<i64: 1, 6>}, {transform_indices = @transform_3, window_bounds = array<i64: 1, 196, 6>}]} {
    %c0 = arith.constant 0 : index
    %c0_0 = arith.constant 0 : index
    %0 = vector.load %arg2[%c0, %c0_0] : memref<75x6xf32, #tpu.memory_space<vmem>>, vector<75x6xf32>
    %c0_1 = arith.constant 0 : index
    %c0_2 = arith.constant 0 : index
    %1 = vector.load %arg3[%c0_1, %c0_2] : memref<1x6xf32, #tpu.memory_space<vmem>>, vector<1x6xf32>
    %c0_3 = arith.constant 0 : index
    %c0_4 = arith.constant 0 : index
    %c0_5 = arith.constant 0 : index
    %c0_6 = arith.constant 0 : index
    %2 = vector.load %arg1[%c0_3, %c0_4, %c0_5, %c0_6] : memref<1x4x196x75xf32, #tpu.memory_space<vmem>>, vector<1x1x196x75xf32>
    %3 = vector.shape_cast %2 : vector<1x1x196x75xf32> to vector<196x75xf32>
    %cst = arith.constant dense<0.000000e+00> : vector<196x6xf32>
    %4 = tpu.matmul %3, %0, %cst {dimension_numbers = #tpu.dot_dimension_numbers<[1], [0], [0], [1], [0, 0, 1, 1], [], []>} : vector<196x75xf32>, vector<75x6xf32>, vector<196x6xf32> -> vector<196x6xf32>
    %5 = vector.broadcast %1 : vector<1x6xf32> to vector<196x6xf32>
    %6 = arith.addf %4, %5 : vector<196x6xf32>
    %cst_7 = arith.constant 0.000000e+00 : f32
    %7 = vector.broadcast %cst_7 : f32 to vector<196x6xf32>
    %8 = arith.maximumf %6, %7 : vector<196x6xf32>
    %c0_8 = arith.constant 0 : index
    %c1 = arith.constant 1 : index
    %c0_9 = arith.constant 0 : index
    %c0_10 = arith.constant 0 : index
    %9 = vector.load %arg1[%c0_8, %c1, %c0_9, %c0_10] : memref<1x4x196x75xf32, #tpu.memory_space<vmem>>, vector<1x1x196x75xf32>
    %10 = vector.shape_cast %9 : vector<1x1x196x75xf32> to vector<196x75xf32>
    %cst_11 = arith.constant dense<0.000000e+00> : vector<196x6xf32>
    %11 = tpu.matmul %10, %0, %cst_11 {dimension_numbers = #tpu.dot_dimension_numbers<[1], [0], [0], [1], [0, 0, 1, 1], [], []>} : vector<196x75xf32>, vector<75x6xf32>, vector<196x6xf32> -> vector<196x6xf32>
    %12 = vector.broadcast %1 : vector<1x6xf32> to vector<196x6xf32>
    %13 = arith.addf %11, %12 : vector<196x6xf32>
    %cst_12 = arith.constant 0.000000e+00 : f32
    %14 = vector.broadcast %cst_12 : f32 to vector<196x6xf32>
    %15 = arith.maximumf %13, %14 : vector<196x6xf32>
    %16 = arith.maximumf %8, %15 : vector<196x6xf32>
    %c0_13 = arith.constant 0 : index
    %c2 = arith.constant 2 : index
    %c0_14 = arith.constant 0 : index
    %c0_15 = arith.constant 0 : index
    %17 = vector.load %arg1[%c0_13, %c2, %c0_14, %c0_15] : memref<1x4x196x75xf32, #tpu.memory_space<vmem>>, vector<1x1x196x75xf32>
    %18 = vector.shape_cast %17 : vector<1x1x196x75xf32> to vector<196x75xf32>
    %cst_16 = arith.constant dense<0.000000e+00> : vector<196x6xf32>
    %19 = tpu.matmul %18, %0, %cst_16 {dimension_numbers = #tpu.dot_dimension_numbers<[1], [0], [0], [1], [0, 0, 1, 1], [], []>} : vector<196x75xf32>, vector<75x6xf32>, vector<196x6xf32> -> vector<196x6xf32>
    %20 = vector.broadcast %1 : vector<1x6xf32> to vector<196x6xf32>
    %21 = arith.addf %19, %20 : vector<196x6xf32>
    %cst_17 = arith.constant 0.000000e+00 : f32
    %22 = vector.broadcast %cst_17 : f32 to vector<196x6xf32>
    %23 = arith.maximumf %21, %22 : vector<196x6xf32>
    %c0_18 = arith.constant 0 : index
    %c3 = arith.constant 3 : index
    %c0_19 = arith.constant 0 : index
    %c0_20 = arith.constant 0 : index
    %24 = vector.load %arg1[%c0_18, %c3, %c0_19, %c0_20] : memref<1x4x196x75xf32, #tpu.memory_space<vmem>>, vector<1x1x196x75xf32>
    %25 = vector.shape_cast %24 : vector<1x1x196x75xf32> to vector<196x75xf32>
    %cst_21 = arith.constant dense<0.000000e+00> : vector<196x6xf32>
    %26 = tpu.matmul %25, %0, %cst_21 {dimension_numbers = #tpu.dot_dimension_numbers<[1], [0], [0], [1], [0, 0, 1, 1], [], []>} : vector<196x75xf32>, vector<75x6xf32>, vector<196x6xf32> -> vector<196x6xf32>
    %27 = vector.broadcast %1 : vector<1x6xf32> to vector<196x6xf32>
    %28 = arith.addf %26, %27 : vector<196x6xf32>
    %cst_22 = arith.constant 0.000000e+00 : f32
    %29 = vector.broadcast %cst_22 : f32 to vector<196x6xf32>
    %30 = arith.maximumf %28, %29 : vector<196x6xf32>
    %31 = arith.maximumf %23, %30 : vector<196x6xf32>
    %32 = arith.maximumf %16, %31 : vector<196x6xf32>
    %c0_23 = arith.constant 0 : index
    %c0_24 = arith.constant 0 : index
    %c0_25 = arith.constant 0 : index
    %33 = vector.load %arg4[%c0_23, %c0_24, %c0_25] : memref<1x196x6xf32, #tpu.memory_space<vmem>>, vector<1x196x6xf32>
    %34 = vector.shape_cast %33 : vector<1x196x6xf32> to vector<196x6xf32>
    %35 = vector.shape_cast %32 : vector<196x6xf32> to vector<1x196x6xf32>
    tpu.vector_store %arg4[%c0_23, %c0_24, %c0_25], %35 {strides = array<i32>} : memref<1x196x6xf32, #tpu.memory_space<vmem>>, vector<1x196x6xf32>,
    return
  }
  func.func @transform_0(%arg0: i32) -> (i32, i32, i32, i32) {
    %c0_i32 = arith.constant 0 : i32
    %c0_i32_0 = arith.constant 0 : i32
    %c0_i32_1 = arith.constant 0 : i32
    %c0_i32_2 = arith.constant 0 : i32
    return %arg0, %c0_i32, %c0_i32_0, %c0_i32_1 : i32, i32, i32, i32
  }
  func.func @transform_1(%arg0: i32) -> (i32, i32) {
    %c0_i32 = arith.constant 0 : i32
    %c0_i32_0 = arith.constant 0 : i32
    %c0_i32_1 = arith.constant 0 : i32
    return %c0_i32, %c0_i32_0 : i32, i32
  }
  func.func @transform_2(%arg0: i32) -> (i32, i32) {
    %c0_i32 = arith.constant 0 : i32
    %c0_i32_0 = arith.constant 0 : i32
    %c0_i32_1 = arith.constant 0 : i32
    return %c0_i32, %c0_i32_0 : i32, i32
  }
  func.func @transform_3(%arg0: i32) -> (i32, i32, i32) {
    %c0_i32 = arith.constant 0 : i32
    %c0_i32_0 = arith.constant 0 : i32
    %c0_i32_1 = arith.constant 0 : i32
    return %arg0, %c0_i32, %c0_i32_0 : i32, i32, i32
  }
}

module attributes {stable_mosaic.version = 11 : i64} {
  func.func @_conv_relu_pool_kernel(%arg0: i32, %arg1: memref<1x4x25x150xf32, #tpu.memory_space<vmem>>, %arg2: memref<150x16xf32, #tpu.memory_space<vmem>>, %arg3: memref<1x16xf32, #tpu.memory_space<vmem>>, %arg4: memref<1x25x16xf32, #tpu.memory_space<vmem>>) attributes {dimension_semantics = [#tpu.dimension_semantics<parallel>], iteration_bounds = array<i64: 2>, scalar_prefetch = 0 : i64, scratch_operands = 0 : i64, tpu.core_type = #tpu.core_type<tc>, window_params = [{transform_indices = @transform_0, window_bounds = array<i64: 1, 4, 25, 150>}, {pipeline_mode = #tpu.pipeline_mode<synchronous>, transform_indices = @transform_1, window_bounds = array<i64: 150, 16>}, {pipeline_mode = #tpu.pipeline_mode<synchronous>, transform_indices = @transform_2, window_bounds = array<i64: 1, 16>}, {transform_indices = @transform_3, window_bounds = array<i64: 1, 25, 16>}]} {
    %c0 = arith.constant 0 : index
    %c0_0 = arith.constant 0 : index
    %0 = vector.load %arg2[%c0, %c0_0] : memref<150x16xf32, #tpu.memory_space<vmem>>, vector<150x16xf32>
    %c0_1 = arith.constant 0 : index
    %c0_2 = arith.constant 0 : index
    %1 = vector.load %arg3[%c0_1, %c0_2] : memref<1x16xf32, #tpu.memory_space<vmem>>, vector<1x16xf32>
    %c0_3 = arith.constant 0 : index
    %c0_4 = arith.constant 0 : index
    %c0_5 = arith.constant 0 : index
    %c0_6 = arith.constant 0 : index
    %2 = vector.load %arg1[%c0_3, %c0_4, %c0_5, %c0_6] : memref<1x4x25x150xf32, #tpu.memory_space<vmem>>, vector<1x1x25x150xf32>
    %3 = vector.shape_cast %2 : vector<1x1x25x150xf32> to vector<25x150xf32>
    %cst = arith.constant dense<0.000000e+00> : vector<25x16xf32>
    %4 = tpu.matmul %3, %0, %cst {dimension_numbers = #tpu.dot_dimension_numbers<[1], [0], [0], [1], [0, 0, 1, 1], [], []>} : vector<25x150xf32>, vector<150x16xf32>, vector<25x16xf32> -> vector<25x16xf32>
    %5 = vector.broadcast %1 : vector<1x16xf32> to vector<25x16xf32>
    %6 = arith.addf %4, %5 : vector<25x16xf32>
    %cst_7 = arith.constant 0.000000e+00 : f32
    %7 = vector.broadcast %cst_7 : f32 to vector<25x16xf32>
    %8 = arith.maximumf %6, %7 : vector<25x16xf32>
    %c0_8 = arith.constant 0 : index
    %c1 = arith.constant 1 : index
    %c0_9 = arith.constant 0 : index
    %c0_10 = arith.constant 0 : index
    %9 = vector.load %arg1[%c0_8, %c1, %c0_9, %c0_10] : memref<1x4x25x150xf32, #tpu.memory_space<vmem>>, vector<1x1x25x150xf32>
    %10 = vector.shape_cast %9 : vector<1x1x25x150xf32> to vector<25x150xf32>
    %cst_11 = arith.constant dense<0.000000e+00> : vector<25x16xf32>
    %11 = tpu.matmul %10, %0, %cst_11 {dimension_numbers = #tpu.dot_dimension_numbers<[1], [0], [0], [1], [0, 0, 1, 1], [], []>} : vector<25x150xf32>, vector<150x16xf32>, vector<25x16xf32> -> vector<25x16xf32>
    %12 = vector.broadcast %1 : vector<1x16xf32> to vector<25x16xf32>
    %13 = arith.addf %11, %12 : vector<25x16xf32>
    %cst_12 = arith.constant 0.000000e+00 : f32
    %14 = vector.broadcast %cst_12 : f32 to vector<25x16xf32>
    %15 = arith.maximumf %13, %14 : vector<25x16xf32>
    %16 = arith.maximumf %8, %15 : vector<25x16xf32>
    %c0_13 = arith.constant 0 : index
    %c2 = arith.constant 2 : index
    %c0_14 = arith.constant 0 : index
    %c0_15 = arith.constant 0 : index
    %17 = vector.load %arg1[%c0_13, %c2, %c0_14, %c0_15] : memref<1x4x25x150xf32, #tpu.memory_space<vmem>>, vector<1x1x25x150xf32>
    %18 = vector.shape_cast %17 : vector<1x1x25x150xf32> to vector<25x150xf32>
    %cst_16 = arith.constant dense<0.000000e+00> : vector<25x16xf32>
    %19 = tpu.matmul %18, %0, %cst_16 {dimension_numbers = #tpu.dot_dimension_numbers<[1], [0], [0], [1], [0, 0, 1, 1], [], []>} : vector<25x150xf32>, vector<150x16xf32>, vector<25x16xf32> -> vector<25x16xf32>
    %20 = vector.broadcast %1 : vector<1x16xf32> to vector<25x16xf32>
    %21 = arith.addf %19, %20 : vector<25x16xf32>
    %cst_17 = arith.constant 0.000000e+00 : f32
    %22 = vector.broadcast %cst_17 : f32 to vector<25x16xf32>
    %23 = arith.maximumf %21, %22 : vector<25x16xf32>
    %c0_18 = arith.constant 0 : index
    %c3 = arith.constant 3 : index
    %c0_19 = arith.constant 0 : index
    %c0_20 = arith.constant 0 : index
    %24 = vector.load %arg1[%c0_18, %c3, %c0_19, %c0_20] : memref<1x4x25x150xf32, #tpu.memory_space<vmem>>, vector<1x1x25x150xf32>
    %25 = vector.shape_cast %24 : vector<1x1x25x150xf32> to vector<25x150xf32>
    %cst_21 = arith.constant dense<0.000000e+00> : vector<25x16xf32>
    %26 = tpu.matmul %25, %0, %cst_21 {dimension_numbers = #tpu.dot_dimension_numbers<[1], [0], [0], [1], [0, 0, 1, 1], [], []>} : vector<25x150xf32>, vector<150x16xf32>, vector<25x16xf32> -> vector<25x16xf32>
    %27 = vector.broadcast %1 : vector<1x16xf32> to vector<25x16xf32>
    %28 = arith.addf %26, %27 : vector<25x16xf32>
    %cst_22 = arith.constant 0.000000e+00 : f32
    %29 = vector.broadcast %cst_22 : f32 to vector<25x16xf32>
    %30 = arith.maximumf %28, %29 : vector<25x16xf32>
    %31 = arith.maximumf %23, %30 : vector<25x16xf32>
    %32 = arith.maximumf %16, %31 : vector<25x16xf32>
    %c0_23 = arith.constant 0 : index
    %c0_24 = arith.constant 0 : index
    %c0_25 = arith.constant 0 : index
    %33 = vector.load %arg4[%c0_23, %c0_24, %c0_25] : memref<1x25x16xf32, #tpu.memory_space<vmem>>, vector<1x25x16xf32>
    %34 = vector.shape_cast %33 : vector<1x25x16xf32> to vector<25x16xf32>
    %35 = vector.shape_cast %32 : vector<25x16xf32> to vector<1x25x16xf32>
    tpu.vector_store %arg4[%c0_23, %c0_24, %c0_25], %35 {strides = array<i32>} : memref<1x25x16xf32, #tpu.memory_space<vmem>>, vector<1x25x16xf32>,
    return
  }
  func.func @transform_0(%arg0: i32) -> (i32, i32, i32, i32) {
    %c0_i32 = arith.constant 0 : i32
    %c0_i32_0 = arith.constant 0 : i32
    %c0_i32_1 = arith.constant 0 : i32
    %c0_i32_2 = arith.constant 0 : i32
    return %arg0, %c0_i32, %c0_i32_0, %c0_i32_1 : i32, i32, i32, i32
  }
  func.func @transform_1(%arg0: i32) -> (i32, i32) {
    %c0_i32 = arith.constant 0 : i32
    %c0_i32_0 = arith.constant 0 : i32
    %c0_i32_1 = arith.constant 0 : i32
    return %c0_i32, %c0_i32_0 : i32, i32
  }
  func.func @transform_2(%arg0: i32) -> (i32, i32) {
    %c0_i32 = arith.constant 0 : i32
    %c0_i32_0 = arith.constant 0 : i32
    %c0_i32_1 = arith.constant 0 : i32
    return %c0_i32, %c0_i32_0 : i32, i32
  }
  func.func @transform_3(%arg0: i32) -> (i32, i32, i32) {
    %c0_i32 = arith.constant 0 : i32
    %c0_i32_0 = arith.constant 0 : i32
    %c0_i32_1 = arith.constant 0 : i32
    return %arg0, %c0_i32, %c0_i32_0 : i32, i32, i32
  }
}

module attributes {stable_mosaic.version = 11 : i64} {
  func.func @_fc_stack_kernel(%arg0: memref<2x400xf32, #tpu.memory_space<vmem>>, %arg1: memref<400x120xf32, #tpu.memory_space<vmem>>, %arg2: memref<1x120xf32, #tpu.memory_space<vmem>>, %arg3: memref<120x84xf32, #tpu.memory_space<vmem>>, %arg4: memref<1x84xf32, #tpu.memory_space<vmem>>, %arg5: memref<84x10xf32, #tpu.memory_space<vmem>>, %arg6: memref<1x10xf32, #tpu.memory_space<vmem>>, %arg7: memref<2x10xf32, #tpu.memory_space<vmem>>) attributes {dimension_semantics = [], scalar_prefetch = 0 : i64, scratch_operands = 0 : i64, tpu.core_type = #tpu.core_type<tc>} {
    %c0 = arith.constant 0 : index
    %c0_0 = arith.constant 0 : index
    %0 = vector.load %arg0[%c0, %c0_0] : memref<2x400xf32, #tpu.memory_space<vmem>>, vector<2x400xf32>
    %c0_1 = arith.constant 0 : index
    %c0_2 = arith.constant 0 : index
    %1 = vector.load %arg1[%c0_1, %c0_2] : memref<400x120xf32, #tpu.memory_space<vmem>>, vector<400x120xf32>
    %cst = arith.constant dense<0.000000e+00> : vector<2x120xf32>
    %2 = tpu.matmul %0, %1, %cst {dimension_numbers = #tpu.dot_dimension_numbers<[1], [0], [0], [1], [0, 0, 1, 1], [], []>} : vector<2x400xf32>, vector<400x120xf32>, vector<2x120xf32> -> vector<2x120xf32>
    %c0_3 = arith.constant 0 : index
    %c0_4 = arith.constant 0 : index
    %3 = vector.load %arg2[%c0_3, %c0_4] : memref<1x120xf32, #tpu.memory_space<vmem>>, vector<1x120xf32>
    %4 = vector.broadcast %3 : vector<1x120xf32> to vector<2x120xf32>
    %5 = arith.addf %2, %4 : vector<2x120xf32>
    %cst_5 = arith.constant 0.000000e+00 : f32
    %6 = vector.broadcast %cst_5 : f32 to vector<2x120xf32>
    %7 = arith.maximumf %5, %6 : vector<2x120xf32>
    %c0_6 = arith.constant 0 : index
    %c0_7 = arith.constant 0 : index
    %8 = vector.load %arg3[%c0_6, %c0_7] : memref<120x84xf32, #tpu.memory_space<vmem>>, vector<120x84xf32>
    %cst_8 = arith.constant dense<0.000000e+00> : vector<2x84xf32>
    %9 = tpu.matmul %7, %8, %cst_8 {dimension_numbers = #tpu.dot_dimension_numbers<[1], [0], [0], [1], [0, 0, 1, 1], [], []>} : vector<2x120xf32>, vector<120x84xf32>, vector<2x84xf32> -> vector<2x84xf32>
    %c0_9 = arith.constant 0 : index
    %c0_10 = arith.constant 0 : index
    %10 = vector.load %arg4[%c0_9, %c0_10] : memref<1x84xf32, #tpu.memory_space<vmem>>, vector<1x84xf32>
    %11 = vector.broadcast %10 : vector<1x84xf32> to vector<2x84xf32>
    %12 = arith.addf %9, %11 : vector<2x84xf32>
    %cst_11 = arith.constant 0.000000e+00 : f32
    %13 = vector.broadcast %cst_11 : f32 to vector<2x84xf32>
    %14 = arith.maximumf %12, %13 : vector<2x84xf32>
    %c0_12 = arith.constant 0 : index
    %c0_13 = arith.constant 0 : index
    %15 = vector.load %arg5[%c0_12, %c0_13] : memref<84x10xf32, #tpu.memory_space<vmem>>, vector<84x10xf32>
    %cst_14 = arith.constant dense<0.000000e+00> : vector<2x10xf32>
    %16 = tpu.matmul %14, %15, %cst_14 {dimension_numbers = #tpu.dot_dimension_numbers<[1], [0], [0], [1], [0, 0, 1, 1], [], []>} : vector<2x84xf32>, vector<84x10xf32>, vector<2x10xf32> -> vector<2x10xf32>
    %c0_15 = arith.constant 0 : index
    %c0_16 = arith.constant 0 : index
    %17 = vector.load %arg6[%c0_15, %c0_16] : memref<1x10xf32, #tpu.memory_space<vmem>>, vector<1x10xf32>
    %18 = vector.broadcast %17 : vector<1x10xf32> to vector<2x10xf32>
    %19 = arith.addf %16, %18 : vector<2x10xf32>
    %c0_17 = arith.constant 0 : index
    %c0_18 = arith.constant 0 : index
    %20 = vector.load %arg7[%c0_17, %c0_18] : memref<2x10xf32, #tpu.memory_space<vmem>>, vector<2x10xf32>
    tpu.vector_store %arg7[%c0_17, %c0_18], %19 {strides = array<i32>} : memref<2x10xf32, #tpu.memory_space<vmem>>, vector<2x10xf32>,
    return
  }
}

</mosaic_0001>

<bundles_post_ra>
// kernel: net_forward.3
= control target key start
LH: loop header
LB: loop body
LE: loop exit
PB: predicated region body
PF: predicated region fallthrough
CT: control target
= control target key end

     0   :  { %s1445_s12 = smov 0   ;;  %s1854_s0 = inlined_call_operand.vmem [shape: f32[2,4,196,75], index: 0, kind: input, shape index: {}]   ;;  %s1855_s1 = inlined_call_operand.vmem [shape: f32[75,6], index: 1, kind: input, shape index: {}]   ;;  %s1856_s2 = inlined_call_operand.vmem [shape: f32[1,6], index: 2, kind: input, shape index: {}]   ;;  %s1857_s3 = inlined_call_operand.vmem [shape: f32[2,196,6], index: 3, kind: output, shape index: {}]  }
   0x1 LB: > { %s1218_s13 = sadd.s32 4294967295, %s1423_s12   ;;  %p1222_p0 = scmp.ge.s32.totalorder %s1423_s12, 1  ;;  %s1423_s12 = sphi %s1445_s12, %s13_s12  }
   0x2   : > { %p137_p1 = scmp.lt.s32.totalorder %s1423_s12, 3 }
   0x4   : > { %p138_p2 = pnand %p1222_p0, %p137_p1 }
   0x5   : > { %p161_p3 = scmp.lt.s32.totalorder (!%p138_p2), %s1218_s13, 1 }
   0x6   : > { %141 = sbr.rel (%p138_p2) target bundleno = 364 (0x16c), region = 32 }
   0xb   : > { %v180_v0 = vld [vmem:[%s1855_s1 + $0x48] sm:$0x7]  ;;  %vm286_vm0 = vcmask 1042432   ;;  %v179_v1 = vld [vmem:[%s1855_s1 + $0x40] sm:$0xff]  ;;  %v178_v2 = vld [vmem:[%s1855_s1 + $0x38] sm:$0xff]  ;;  %s1859_s13 = smov (!%p161_p3, %s1218_s13), 1 }
   0xc   : > { %1327 = vmatpush.msk.msra.mxu2 %vm286_vm0, %v180_v0  ;;  %1378 = vmatpush.msk.msra.mxu3 %vm286_vm0, %v180_v0  ;;  %v177_v3 = vld [vmem:[%s1855_s1 + $0x30] sm:$0xff]  ;;  %v176_v4 = vld [vmem:[%s1855_s1 + $0x28] sm:$0xff]  ;;  %v175_v5 = vld [vmem:[%s1855_s1 + $0x20] sm:$0xff]  ;;  %s1406_s28 = smul.u32 800, %s1859_s13  ;;  %vm210_vm1 = vcmask 613376   ;;  %vm1136_vm2 = vcmask 48128  }
   0xd   : > { %1225 = vmatpush.msk.msra.mxu0 %vm286_vm0, %v180_v0  ;;  %1276 = vmatpush.msk.msra.mxu1 %vm286_vm0, %v180_v0  ;;  %v174_v6 = vld [vmem:[%s1855_s1 + $0x18] sm:$0xff]  ;;  %v173_v7 = vld [vmem:[%s1855_s1 + $0x10] sm:$0xff]  ;;  %v172_v8 = vld [vmem:[%s1855_s1 + $0x8] sm:$0xff]  ;;  %s1407_s15 = smul.u32 200, %s1859_s13  ;;  %vm1161_vm3 = vcmask 44032  }
   0xe   : > { %758 = vmatpush.msra.mxu2 %v179_v1  ;;  %976 = vmatpush.msra.mxu3 %v179_v1  ;;  %s1486_s8 = scalar_lea.vmem %s1854_s0, %s1406_s28  ;;  %v171_v9 = vld [vmem:[%s1855_s1] sm:$0xff] }
   0xf   : > { %297 = vmatpush.msra.mxu0 %v179_v1  ;;  %515 = vmatpush.msra.mxu1 %v179_v1  ;;  %v1302_v10 = vld [vmem:[%s1486_s8 + $0x190] sm:$0xff]  ;;  %v1353_v11 = vld [vmem:[%s1486_s8 + $0x258] sm:$0xff]  ;;  %v182_v12 = vld [vmem:[%s1486_s8] sm:$0xff]  ;;  %s1648_s17 = scalar_lea.vmem %s1857_s3, %s1407_s15 }
  0x10   : > { %759 = vmatpush.msra.mxu2 %v178_v2  ;;  %977 = vmatpush.msra.mxu3 %v178_v2  ;;  %v1251_v13 = vld [vmem:[%s1486_s8 + $0xc8] sm:$0xff]  ;;  %v1303_v14 = vld [vmem:[%s1486_s8 + $0x198] sm:$0xff]  ;;  %v1354_v15 = vld [vmem:[%s1486_s8 + $0x260] sm:$0xff] }
  0x11   : > { %298 = vmatpush.msra.mxu0 %v178_v2  ;;  %516 = vmatpush.msra.mxu1 %v178_v2  ;;  %v183_v16 = vld [vmem:[%s1486_s8 + $0x8] sm:$0xff]  ;;  %v1252_v17 = vld [vmem:[%s1486_s8 + $0xd0] sm:$0xff]  ;;  %v1304_v18 = vld [vmem:[%s1486_s8 + $0x1a0] sm:$0xff] }
  0x12   : > { %760 = vmatpush.msra.mxu2 %v177_v3  ;;  %978 = vmatpush.msra.mxu3 %v177_v3  ;;  %v1355_v19 = vld [vmem:[%s1486_s8 + $0x268] sm:$0xff]  ;;  %v184_v20 = vld [vmem:[%s1486_s8 + $0x10] sm:$0xff]  ;;  %v1253_v21 = vld [vmem:[%s1486_s8 + $0xd8] sm:$0xff] }
  0x13   : > { %299 = vmatpush.msra.mxu0 %v177_v3  ;;  %517 = vmatpush.msra.mxu1 %v177_v3  ;;  %v1305_v22 = vld [vmem:[%s1486_s8 + $0x1a8] sm:$0xff]  ;;  %v1356_v23 = vld [vmem:[%s1486_s8 + $0x270] sm:$0xff]  ;;  %v185_v24 = vld [vmem:[%s1486_s8 + $0x18] sm:$0xff] }
  0x14   : > { %761 = vmatpush.msra.mxu2 %v176_v4  ;;  %979 = vmatpush.msra.mxu3 %v176_v4  ;;  %v1254_v25 = vld [vmem:[%s1486_s8 + $0xe0] sm:$0xff]  ;;  %v1306_v26 = vld [vmem:[%s1486_s8 + $0x1b0] sm:$0xff]  ;;  %v1357_v27 = vld [vmem:[%s1486_s8 + $0x278] sm:$0xff] }
  0x15   : > { %300 = vmatpush.msra.mxu0 %v176_v4  ;;  %518 = vmatpush.msra.mxu1 %v176_v4  ;;  %v186_v28 = vld [vmem:[%s1486_s8 + $0x20] sm:$0xff]  ;;  %v1255_v29 = vld [vmem:[%s1486_s8 + $0xe8] sm:$0xff]  ;;  %v1307_v30 = vld [vmem:[%s1486_s8 + $0x1b8] sm:$0xff] }
  0x16   : > { %762 = vmatpush.msra.mxu2 %v175_v5  ;;  %980 = vmatpush.msra.mxu3 %v175_v5  ;;  %v1358_v31 = vld [vmem:[%s1486_s8 + $0x280] sm:$0xff]  ;;  %v187_v32 = vld [vmem:[%s1486_s8 + $0x28] sm:$0xff]  ;;  %v1256_v33 = vld [vmem:[%s1486_s8 + $0xf0] sm:$0xff] }
  0x17   : > { %301 = vmatpush.msra.mxu0 %v175_v5  ;;  %519 = vmatpush.msra.mxu1 %v175_v5  ;;  %v1308_v34 = vld [vmem:[%s1486_s8 + $0x1c0] sm:$0xff]  ;;  %v1359_v35 = vld [vmem:[%s1486_s8 + $0x288] sm:$0xff]  ;;  %v188_v36 = vld [vmem:[%s1486_s8 + $0x30] sm:$0xff] }
  0x18   : > { %763 = vmatpush.msra.mxu2 %v174_v6  ;;  %981 = vmatpush.msra.mxu3 %v174_v6  ;;  %v1257_v37 = vld [vmem:[%s1486_s8 + $0xf8] sm:$0xff]  ;;  %v1309_v38 = vld [vmem:[%s1486_s8 + $0x1c8] sm:$0xff]  ;;  %v1360_v39 = vld [vmem:[%s1486_s8 + $0x290] sm:$0xff] }
  0x19   : > { %302 = vmatpush.msra.mxu0 %v174_v6  ;;  %520 = vmatpush.msra.mxu1 %v174_v6  ;;  %v189_v40 = vld [vmem:[%s1486_s8 + $0x38] sm:$0xff]  ;;  %v1258_v41 = vld [vmem:[%s1486_s8 + $0x100] sm:$0xff]  ;;  %v1310_v42 = vld [vmem:[%s1486_s8 + $0x1d0] sm:$0xff] }
  0x1a   : > { %764 = vmatpush.msra.mxu2 %v173_v7  ;;  %982 = vmatpush.msra.mxu3 %v173_v7  ;;  %v1361_v43 = vld [vmem:[%s1486_s8 + $0x298] sm:$0xff]  ;;  %v190_v44 = vld [vmem:[%s1486_s8 + $0x40] sm:$0xff]  ;;  %v1259_v45 = vld [vmem:[%s1486_s8 + $0x108] sm:$0xff] }
  0x1b   : > { %303 = vmatpush.msra.mxu0 %v173_v7  ;;  %521 = vmatpush.msra.mxu1 %v173_v7  ;;  %v1311_v46 = vld [vmem:[%s1486_s8 + $0x1d8] sm:$0xff]  ;;  %v1362_v47 = vld [vmem:[%s1486_s8 + $0x2a0] sm:$0xff]  ;;  %v191_v48 = vld [vmem:[%s1486_s8 + $0x48] sm:$0xff] }
  0x1c   : > { %765 = vmatpush.msra.mxu2 %v172_v8  ;;  %983 = vmatpush.msra.mxu3 %v172_v8  ;;  %v1260_v49 = vld [vmem:[%s1486_s8 + $0x110] sm:$0xff]  ;;  %v1312_v50 = vld [vmem:[%s1486_s8 + $0x1e0] sm:$0xff]  ;;  %v1363_v51 = vld [vmem:[%s1486_s8 + $0x2a8] sm:$0xff] }
  0x1d   : > { %304 = vmatpush.msra.mxu0 %v172_v8  ;;  %522 = vmatpush.msra.mxu1 %v172_v8  ;;  %v192_v52 = vld [vmem:[%s1486_s8 + $0x50] sm:$0xff]  ;;  %v1261_v53 = vld [vmem:[%s1486_s8 + $0x118] sm:$0xff]  ;;  %v1313_v54 = vld [vmem:[%s1486_s8 + $0x1e8] sm:$0xff] }
  0x1e   : > { %766 = vmatpush.msra.mxu2 %v171_v9  ;;  %984 = vmatpush.msra.mxu3 %v171_v9  ;;  %v1364_v55 = vld [vmem:[%s1486_s8 + $0x2b0] sm:$0xff]  ;;  %v193_v56 = vld [vmem:[%s1486_s8 + $0x58] sm:$0xff]  ;;  %v1262_v57 = vld [vmem:[%s1486_s8 + $0x120] sm:$0xff] }
  0x1f   : > { %1328 = vmatmul.msk.f32.vlgmr.msra.gmra.mxu2 %vm210_vm1, %v1302_v10  ;;  %1379 = vmatmul.msk.f32.vlgmr.msra.gmra.mxu3 %vm210_vm1, %v1353_v11  ;;  %v1314_v58 = vld [vmem:[%s1486_s8 + $0x1f0] sm:$0xff]  ;;  %v1365_v59 = vld [vmem:[%s1486_s8 + $0x2b8] sm:$0xff]  ;;  %v194_v60 = vld [vmem:[%s1486_s8 + $0x60] sm:$0xff] }
  0x20   : > { %305 = vmatpush.msra.mxu0 %v171_v9  ;;  %523 = vmatpush.msra.mxu1 %v171_v9  ;;  %v1263_v61 = vld [vmem:[%s1486_s8 + $0x128] sm:$0xff]  ;;  %v1315_v62 = vld [vmem:[%s1486_s8 + $0x1f8] sm:$0xff]  ;;  %v1366_v63 = vld [vmem:[%s1486_s8 + $0x2c0] sm:$0xff] }
  0x21   : > { %1226 = vmatmul.msk.f32.vlgmr.msra.gmra.mxu0 %vm210_vm1, %v182_v12  ;;  %1277 = vmatmul.msk.f32.vlgmr.msra.gmra.mxu1 %vm210_vm1, %v1251_v13  ;;  %v195_v0 = vld [vmem:[%s1486_s8 + $0x68] sm:$0xff]  ;;  %v1264_v1 = vld [vmem:[%s1486_s8 + $0x130] sm:$0xff]  ;;  %v1316_v2 = vld [vmem:[%s1486_s8 + $0x200] sm:$0xff] }
  0x22   : > { %v1367_v3 = vld [vmem:[%s1486_s8 + $0x2c8] sm:$0xff]  ;;  %v196_v4 = vld [vmem:[%s1486_s8 + $0x70] sm:$0xff]  ;;  %v1265_v5 = vld [vmem:[%s1486_s8 + $0x138] sm:$0xff] }
  0x23   : > { %v1317_v6 = vld [vmem:[%s1486_s8 + $0x208] sm:$0xff]  ;;  %v1368_v7 = vld [vmem:[%s1486_s8 + $0x2d0] sm:$0xff]  ;;  %v197_v8 = vld [vmem:[%s1486_s8 + $0x78] sm:$0xff] }
  0x24   : > { %v1266_v9 = vld [vmem:[%s1486_s8 + $0x140] sm:$0xff]  ;;  %v1318_v11 = vld [vmem:[%s1486_s8 + $0x210] sm:$0xff]  ;;  %v1369_v12 = vld [vmem:[%s1486_s8 + $0x2d8] sm:$0xff] }
  0x25   : > { %v1622_v10 = vld [vmem:[%s1856_s2] ss:$0 sm:$0xff] }
  0x27   : > { %1329 = vmatmul.msk.f32.gmra.mxu2 %vm210_vm1, %v1303_v14  ;;  %1380 = vmatmul.msk.f32.gmra.mxu3 %vm210_vm1, %v1354_v15  ;;  %v198_v15 = vld [vmem:[%s1486_s8 + $0x80] sm:$0xff] }
  0x29   : > { %1227 = vmatmul.msk.f32.gmra.mxu0 %vm210_vm1, %v183_v16  ;;  %1278 = vmatmul.msk.f32.gmra.mxu1 %vm210_vm1, %v1252_v17  ;;  %v1267_v16 = vld [vmem:[%s1486_s8 + $0x148] sm:$0xff] }
  0x2f   : > { %1330 = vmatmul.msk.f32.gmra.mxu2 %vm210_vm1, %v1304_v18  ;;  %1381 = vmatmul.msk.f32.gmra.mxu3 %vm210_vm1, %v1355_v19 }
  0x31   : > { %1228 = vmatmul.msk.f32.gmra.mxu0 %vm210_vm1, %v184_v20  ;;  %1279 = vmatmul.msk.f32.gmra.mxu1 %vm210_vm1, %v1253_v21 }
  0x37   : > { %1331 = vmatmul.msk.f32.gmra.mxu2 %vm210_vm1, %v1305_v22  ;;  %1382 = vmatmul.msk.f32.gmra.mxu3 %vm210_vm1, %v1356_v23 }
  0x39   : > { %1229 = vmatmul.msk.f32.gmra.mxu0 %vm210_vm1, %v185_v24  ;;  %1280 = vmatmul.msk.f32.gmra.mxu1 %vm210_vm1, %v1254_v25  ;;  %v1319_v25 = vld [vmem:[%s1486_s8 + $0x218] sm:$0xff] }
  0x3f   : > { %1332 = vmatmul.msk.f32.gmra.mxu2 %vm210_vm1, %v1306_v26  ;;  %1383 = vmatmul.msk.f32.gmra.mxu3 %vm210_vm1, %v1357_v27  ;;  %v1370_v26 = vld [vmem:[%s1486_s8 + $0x2e0] sm:$0xff] }
  0x41   : > { %1230 = vmatmul.msk.f32.gmra.mxu0 %vm210_vm1, %v186_v28  ;;  %1281 = vmatmul.msk.f32.gmra.mxu1 %vm210_vm1, %v1255_v29 }
  0x47   : > { %1333 = vmatmul.msk.f32.gmra.mxu2 %vm210_vm1, %v1307_v30  ;;  %1384 = vmatmul.msk.f32.gmra.mxu3 %vm210_vm1, %v1358_v31 }
  0x49   : > { %1231 = vmatmul.msk.f32.gmra.mxu0 %vm210_vm1, %v187_v32  ;;  %1282 = vmatmul.msk.f32.gmra.mxu1 %vm210_vm1, %v1256_v33  ;;  %v199_v32 = vld [vmem:[%s1486_s8 + $0x88] sm:$0xff]  ;;  %v1268_v33 = vld [vmem:[%s1486_s8 + $0x150] sm:$0xff] }
  0x4f   : > { %1334 = vmatmul.msk.f32.gmra.mxu2 %vm210_vm1, %v1308_v34  ;;  %1385 = vmatmul.msk.f32.gmra.mxu3 %vm210_vm1, %v1359_v35 }
  0x51   : > { %1232 = vmatmul.msk.f32.gmra.mxu0 %vm210_vm1, %v188_v36  ;;  %1283 = vmatmul.msk.f32.gmra.mxu1 %vm210_vm1, %v1257_v37 }
  0x57   : > { %1335 = vmatmul.msk.f32.gmra.mxu2 %vm210_vm1, %v1309_v38  ;;  %1386 = vmatmul.msk.f32.gmra.mxu3 %vm210_vm1, %v1360_v39 }
  0x59   : > { %1233 = vmatmul.msk.f32.gmra.mxu0 %vm210_vm1, %v189_v40  ;;  %1284 = vmatmul.msk.f32.gmra.mxu1 %vm210_vm1, %v1258_v41 }
  0x5f   : > { %1336 = vmatmul.msk.f32.gmra.mxu2 %vm210_vm1, %v1310_v42  ;;  %1387 = vmatmul.msk.f32.gmra.mxu3 %vm210_vm1, %v1361_v43 }
  0x61   : > { %1234 = vmatmul.msk.f32.gmra.mxu0 %vm210_vm1, %v190_v44  ;;  %1285 = vmatmul.msk.f32.gmra.mxu1 %vm210_vm1, %v1259_v45  ;;  %v1320_v44 = vld [vmem:[%s1486_s8 + $0x220] sm:$0xff]  ;;  %v1371_v45 = vld [vmem:[%s1486_s8 + $0x2e8] sm:$0xff] }
  0x67   : > { %1337 = vmatmul.msk.f32.gmra.mxu2 %vm210_vm1, %v1311_v46  ;;  %1388 = vmatmul.msk.f32.gmra.mxu3 %vm210_vm1, %v1362_v47 }
  0x69   : > { %1235 = vmatmul.msk.f32.gmra.mxu0 %vm210_vm1, %v191_v48  ;;  %1286 = vmatmul.msk.f32.gmra.mxu1 %vm210_vm1, %v1260_v49 }
  0x6f   : > { %1338 = vmatmul.msk.f32.gmra.mxu2 %vm210_vm1, %v1312_v50  ;;  %1389 = vmatmul.msk.f32.gmra.mxu3 %vm210_vm1, %v1363_v51  ;;  %v200_v51 = vld [vmem:[%s1486_s8 + $0x90] sm:$0xff] }
  0x71   : > { %1236 = vmatmul.msk.f32.gmra.mxu0 %vm210_vm1, %v192_v52  ;;  %1287 = vmatmul.msk.f32.gmra.mxu1 %vm210_vm1, %v1261_v53  ;;  %v1269_v52 = vld [vmem:[%s1486_s8 + $0x158] sm:$0xff] }
  0x77   : > { %1339 = vmatmul.msk.f32.gmra.mxu2 %vm210_vm1, %v1313_v54  ;;  %1390 = vmatmul.msk.f32.gmra.mxu3 %vm210_vm1, %v1364_v55 }
  0x79   : > { %1237 = vmatmul.msk.f32.gmra.mxu0 %vm210_vm1, %v193_v56  ;;  %1288 = vmatmul.msk.f32.gmra.mxu1 %vm210_vm1, %v1262_v57 }
  0x7f   : > { %1340 = vmatmul.msk.f32.gmra.mxu2 %vm210_vm1, %v1314_v58  ;;  %1391 = vmatmul.msk.f32.gmra.mxu3 %vm210_vm1, %v1365_v59 }
  0x81   : > { %1238 = vmatmul.msk.f32.gmra.mxu0 %vm210_vm1, %v194_v60  ;;  %1289 = vmatmul.msk.f32.gmra.mxu1 %vm210_vm1, %v1263_v61 }
  0x87   : > { %1341 = vmatmul.msk.f32.gmra.mxu2 %vm210_vm1, %v1315_v62  ;;  %1392 = vmatmul.msk.f32.gmra.mxu3 %vm210_vm1, %v1366_v63  ;;  %v1321_v63 = vld [vmem:[%s1486_s8 + $0x228] sm:$0xff] }
  0x89   : > { %1239 = vmatmul.msk.f32.gmra.mxu0 %vm210_vm1, %v195_v0  ;;  %1290 = vmatmul.msk.f32.gmra.mxu1 %vm210_vm1, %v1264_v1  ;;  %v1372_v0 = vld [vmem:[%s1486_s8 + $0x2f0] sm:$0xff] }
  0x8f   : > { %1342 = vmatmul.msk.f32.gmra.mxu2 %vm210_vm1, %v1316_v2  ;;  %1393 = vmatmul.msk.f32.gmra.mxu3 %vm210_vm1, %v1367_v3 }
  0x91   : > { %1240 = vmatmul.msk.f32.gmra.mxu0 %vm210_vm1, %v196_v4  ;;  %1291 = vmatmul.msk.f32.gmra.mxu1 %vm210_vm1, %v1265_v5 }
  0x97   : > { %1343 = vmatmul.msk.f32.gmra.mxu2 %vm210_vm1, %v1317_v6  ;;  %1394 = vmatmul.msk.f32.gmra.mxu3 %vm210_vm1, %v1368_v7  ;;  %v201_v6 = vld [vmem:[%s1486_s8 + $0x98] sm:$0xff]  ;;  %v1270_v7 = vld [vmem:[%s1486_s8 + $0x160] sm:$0xff] }
  0x99   : > { %1241 = vmatmul.msk.f32.gmra.mxu0 %vm210_vm1, %v197_v8  ;;  %1292 = vmatmul.msk.f32.gmra.mxu1 %vm210_vm1, %v1266_v9 }
  0x9e   : > { %v307_v13 = vpop.f32.mrf.mxu0  ;;  %v525_v14 = vpop.f32.mrf.mxu1 }
  0x9f   : > { %1344 = vmatmul.msk.f32.gmra.mxu2 %vm210_vm1, %v1318_v11  ;;  %1395 = vmatmul.msk.f32.gmra.mxu3 %vm210_vm1, %v1369_v12  ;;  %v308_v17 = vadd.f32 %v1622_v10, %v307_v13  ;;  %v526_v18 = vadd.f32 %v1622_v10, %v525_v14 }
  0xa1   : > { %v382_v19 = vmax.f32 %v308_v17, 0.0  ;;  %v600_v20 = vmax.f32 %v526_v18, 0.0  ;;  %1242 = vmatmul.msk.f32.gmra.mxu0 %vm210_vm1, %v198_v15  ;;  %1293 = vmatmul.msk.f32.gmra.mxu1 %vm210_vm1, %v1267_v16 }
  0xa2   : > { %v768_v21 = vpop.f32.mrf.mxu2  ;;  %v986_v22 = vpop.f32.mrf.mxu3 }
  0xa3   : > { %v769_v23 = vadd.f32 %v1622_v10, %v768_v21  ;;  %v987_v24 = vadd.f32 %v1622_v10, %v986_v22  ;;  %v625_v27 = vmax.f32 %v382_v19, %v600_v20  ;;  %v1322_v19 = vld [vmem:[%s1486_s8 + $0x230] sm:$0xff]  ;;  %v1373_v20 = vld [vmem:[%s1486_s8 + $0x2f8] sm:$0xff] }
  0xa5   : > { %v843_v28 = vmax.f32 %v769_v23, 0.0  ;;  %v1061_v29 = vmax.f32 %v987_v24, 0.0 }
  0xa6   : > { %v310_v30 = vpop.f32.mrf.mxu0  ;;  %v528_v31 = vpop.f32.mrf.mxu1 }
  0xa7   : > { %v1086_v34 = vmax.f32 %v843_v28, %v1061_v29  ;;  %1345 = vmatmul.msk.f32.gmra.mxu2 %vm210_vm1, %v1319_v25  ;;  %1396 = vmatmul.msk.f32.gmra.mxu3 %vm210_vm1, %v1370_v26  ;;  %v311_v35 = vadd.f32 %v1622_v10, %v310_v30  ;;  %v529_v36 = vadd.f32 %v1622_v10, %v528_v31  ;;  %v202_v26 = vld [vmem:[%s1486_s8 + $0xa0] sm:$0xff] }
  0xa9   : > { %v1111_v37 = vmax.f32 %v625_v27, %v1086_v34  ;;  %v383_v38 = vmax.f32 %v311_v35, 0.0  ;;  %v601_v39 = vmax.f32 %v529_v36, 0.0  ;;  %1243 = vmatmul.msk.f32.gmra.mxu0 %vm210_vm1, %v199_v32  ;;  %1294 = vmatmul.msk.f32.gmra.mxu1 %vm210_vm1, %v1268_v33  ;;  %v1271_v27 = vld [vmem:[%s1486_s8 + $0x168] sm:$0xff] }
  0xaa   : > { %v771_v40 = vpop.f32.mrf.mxu2  ;;  %v989_v41 = vpop.f32.mrf.mxu3 }
  0xab   : > { %1137 = vst.msk [vmem:[%s1648_s17] sm:$0xff] %vm1136_vm2, %v1111_v37  ;;  %v772_v42 = vadd.f32 %v1622_v10, %v771_v40  ;;  %v990_v43 = vadd.f32 %v1622_v10, %v989_v41  ;;  %v626_v46 = vmax.f32 %v383_v38, %v601_v39  ;;  %v1323_v38 = vld [vmem:[%s1486_s8 + $0x238] sm:$0xff]  ;;  %v1374_v39 = vld [vmem:[%s1486_s8 + $0x300] sm:$0xff] }
  0xad   : > { %v844_v47 = vmax.f32 %v772_v42, 0.0  ;;  %v1062_v48 = vmax.f32 %v990_v43, 0.0 }
  0xae   : > { %v313_v49 = vpop.f32.mrf.mxu0  ;;  %v531_v50 = vpop.f32.mrf.mxu1 }
  0xaf   : > { %v1087_v53 = vmax.f32 %v844_v47, %v1062_v48  ;;  %1346 = vmatmul.msk.f32.gmra.mxu2 %vm210_vm1, %v1320_v44  ;;  %1397 = vmatmul.msk.f32.gmra.mxu3 %vm210_vm1, %v1371_v45  ;;  %v314_v54 = vadd.f32 %v1622_v10, %v313_v49  ;;  %v532_v55 = vadd.f32 %v1622_v10, %v531_v50  ;;  %v203_v45 = vld [vmem:[%s1486_s8 + $0xa8] sm:$0xff] }
  0xb1   : > { %v1112_v56 = vmax.f32 %v626_v46, %v1087_v53  ;;  %v384_v57 = vmax.f32 %v314_v54, 0.0  ;;  %v602_v58 = vmax.f32 %v532_v55, 0.0  ;;  %1244 = vmatmul.msk.f32.gmra.mxu0 %vm210_vm1, %v200_v51  ;;  %1295 = vmatmul.msk.f32.gmra.mxu1 %vm210_vm1, %v1269_v52  ;;  %v1272_v46 = vld [vmem:[%s1486_s8 + $0x170] sm:$0xff] }
  0xb2   : > { %v774_v59 = vpop.f32.mrf.mxu2  ;;  %v992_v60 = vpop.f32.mrf.mxu3 }
  0xb3   : > { %1138 = vst.msk [vmem:[%s1648_s17 + $0x8] sm:$0xff] %vm1136_vm2, %v1112_v56  ;;  %v775_v61 = vadd.f32 %v1622_v10, %v774_v59  ;;  %v993_v62 = vadd.f32 %v1622_v10, %v992_v60  ;;  %v627_v1 = vmax.f32 %v384_v57, %v602_v58  ;;  %v1324_v57 = vld [vmem:[%s1486_s8 + $0x240] sm:$0xff]  ;;  %v1375_v58 = vld [vmem:[%s1486_s8 + $0x308] sm:$0xff] }
  0xb5   : > { %v845_v2 = vmax.f32 %v775_v61, 0.0  ;;  %v1063_v3 = vmax.f32 %v993_v62, 0.0 }
  0xb6   : > { %v316_v4 = vpop.f32.mrf.mxu0  ;;  %v534_v5 = vpop.f32.mrf.mxu1 }
  0xb7   : > { %v1088_v8 = vmax.f32 %v845_v2, %v1063_v3  ;;  %1347 = vmatmul.msk.f32.gmra.mxu2 %vm210_vm1, %v1321_v63  ;;  %1398 = vmatmul.msk.f32.gmra.mxu3 %vm210_vm1, %v1372_v0  ;;  %v317_v9 = vadd.f32 %v1622_v10, %v316_v4  ;;  %v535_v11 = vadd.f32 %v1622_v10, %v534_v5  ;;  %v204_v0 = vld [vmem:[%s1486_s8 + $0xb0] sm:$0xff] }
  0xb9   : > { %v1113_v12 = vmax.f32 %v627_v1, %v1088_v8  ;;  %v385_v13 = vmax.f32 %v317_v9, 0.0  ;;  %v603_v14 = vmax.f32 %v535_v11, 0.0  ;;  %1245 = vmatmul.msk.f32.gmra.mxu0 %vm210_vm1, %v201_v6  ;;  %1296 = vmatmul.msk.f32.gmra.mxu1 %vm210_vm1, %v1270_v7  ;;  %v1273_v1 = vld [vmem:[%s1486_s8 + $0x178] sm:$0xff] }
  0xba   : > { %v777_v15 = vpop.f32.mrf.mxu2  ;;  %v995_v16 = vpop.f32.mrf.mxu3 }
  0xbb   : > { %1139 = vst.msk [vmem:[%s1648_s17 + $0x10] sm:$0xff] %vm1136_vm2, %v1113_v12  ;;  %v778_v17 = vadd.f32 %v1622_v10, %v777_v15  ;;  %v996_v18 = vadd.f32 %v1622_v10, %v995_v16  ;;  %v628_v21 = vmax.f32 %v385_v13, %v603_v14  ;;  %v1325_v13 = vld [vmem:[%s1486_s8 + $0x248] sm:$0xff]  ;;  %v1376_v14 = vld [vmem:[%s1486_s8 + $0x310] sm:$0xff] }
  0xbd   : > { %v846_v22 = vmax.f32 %v778_v17, 0.0  ;;  %v1064_v23 = vmax.f32 %v996_v18, 0.0 }
  0xbe   : > { %v319_v24 = vpop.f32.mrf.mxu0  ;;  %v537_v25 = vpop.f32.mrf.mxu1 }
  0xbf   : > { %v1089_v28 = vmax.f32 %v846_v22, %v1064_v23  ;;  %1348 = vmatmul.msk.f32.gmra.mxu2 %vm210_vm1, %v1322_v19  ;;  %1399 = vmatmul.msk.f32.gmra.mxu3 %vm210_vm1, %v1373_v20  ;;  %v320_v29 = vadd.f32 %v1622_v10, %v319_v24  ;;  %v538_v30 = vadd.f32 %v1622_v10, %v537_v25  ;;  %v205_v20 = vld [vmem:[%s1486_s8 + $0xb8] sm:$0xff] }
  0xc1   : > { %v1114_v31 = vmax.f32 %v628_v21, %v1089_v28  ;;  %v386_v32 = vmax.f32 %v320_v29, 0.0  ;;  %v604_v33 = vmax.f32 %v538_v30, 0.0  ;;  %1246 = vmatmul.msk.f32.gmra.mxu0 %vm210_vm1, %v202_v26  ;;  %1297 = vmatmul.msk.f32.gmra.mxu1 %vm210_vm1, %v1271_v27  ;;  %v1274_v21 = vld [vmem:[%s1486_s8 + $0x180] sm:$0xff] }
  0xc2   : > { %v780_v34 = vpop.f32.mrf.mxu2  ;;  %v998_v35 = vpop.f32.mrf.mxu3 }
  0xc3   : > { %1140 = vst.msk [vmem:[%s1648_s17 + $0x18] sm:$0xff] %vm1136_vm2, %v1114_v31  ;;  %v781_v36 = vadd.f32 %v1622_v10, %v780_v34  ;;  %v999_v37 = vadd.f32 %v1622_v10, %v998_v35  ;;  %v629_v40 = vmax.f32 %v386_v32, %v604_v33  ;;  %v1326_v32 = vld [vmem:[%s1486_s8 + $0x250] sm:$0xf]  ;;  %v1377_v33 = vld [vmem:[%s1486_s8 + $0x318] sm:$0xf] }
  0xc5   : > { %v847_v41 = vmax.f32 %v781_v36, 0.0  ;;  %v1065_v42 = vmax.f32 %v999_v37, 0.0 }
  0xc6   : > { %v322_v43 = vpop.f32.mrf.mxu0  ;;  %v540_v44 = vpop.f32.mrf.mxu1 }
  0xc7   : > { %v1090_v47 = vmax.f32 %v847_v41, %v1065_v42  ;;  %1349 = vmatmul.msk.f32.gmra.mxu2 %vm210_vm1, %v1323_v38  ;;  %1400 = vmatmul.msk.f32.gmra.mxu3 %vm210_vm1, %v1374_v39  ;;  %v323_v48 = vadd.f32 %v1622_v10, %v322_v43  ;;  %v541_v49 = vadd.f32 %v1622_v10, %v540_v44  ;;  %v206_v39 = vld [vmem:[%s1486_s8 + $0xc0] sm:$0xf] }
  0xc9   : > { %v1115_v50 = vmax.f32 %v629_v40, %v1090_v47  ;;  %v387_v51 = vmax.f32 %v323_v48, 0.0  ;;  %v605_v52 = vmax.f32 %v541_v49, 0.0  ;;  %1247 = vmatmul.msk.f32.gmra.mxu0 %vm210_vm1, %v203_v45  ;;  %1298 = vmatmul.msk.f32.gmra.mxu1 %vm210_vm1, %v1272_v46  ;;  %v1275_v40 = vld [vmem:[%s1486_s8 + $0x188] sm:$0xf] }
  0xca   : > { %v783_v53 = vpop.f32.mrf.mxu2  ;;  %v1001_v54 = vpop.f32.mrf.mxu3 }
  0xcb   : > { %1141 = vst.msk [vmem:[%s1648_s17 + $0x20] sm:$0xff] %vm1136_vm2, %v1115_v50  ;;  %v784_v55 = vadd.f32 %v1622_v10, %v783_v53  ;;  %v1002_v56 = vadd.f32 %v1622_v10, %v1001_v54  ;;  %v630_v59 = vmax.f32 %v387_v51, %v605_v52 }
  0xcd   : > { %v848_v60 = vmax.f32 %v784_v55, 0.0  ;;  %v1066_v61 = vmax.f32 %v1002_v56, 0.0 }
  0xce   : > { %v325_v62 = vpop.f32.mrf.mxu0  ;;  %v543_v63 = vpop.f32.mrf.mxu1 }
  0xcf   : > { %v1091_v2 = vmax.f32 %v848_v60, %v1066_v61  ;;  %1350 = vmatmul.msk.f32.gmra.mxu2 %vm210_vm1, %v1324_v57  ;;  %1401 = vmatmul.msk.f32.gmra.mxu3 %vm210_vm1, %v1375_v58  ;;  %v326_v3 = vadd.f32 %v1622_v10, %v325_v62  ;;  %v544_v4 = vadd.f32 %v1622_v10, %v543_v63 }
  0xd1   : > { %v1116_v5 = vmax.f32 %v630_v59, %v1091_v2  ;;  %v388_v6 = vmax.f32 %v326_v3, 0.0  ;;  %v606_v7 = vmax.f32 %v544_v4, 0.0  ;;  %1248 = vmatmul.msk.f32.gmra.mxu0 %vm210_vm1, %v204_v0  ;;  %1299 = vmatmul.msk.f32.gmra.mxu1 %vm210_vm1, %v1273_v1 }
  0xd2   : > { %v786_v8 = vpop.f32.mrf.mxu2  ;;  %v1004_v9 = vpop.f32.mrf.mxu3 }
  0xd3   : > { %1142 = vst.msk [vmem:[%s1648_s17 + $0x28] sm:$0xff] %vm1136_vm2, %v1116_v5  ;;  %v787_v11 = vadd.f32 %v1622_v10, %v786_v8  ;;  %v1005_v12 = vadd.f32 %v1622_v10, %v1004_v9  ;;  %v631_v15 = vmax.f32 %v388_v6, %v606_v7 }
  0xd5   : > { %v849_v16 = vmax.f32 %v787_v11, 0.0  ;;  %v1067_v17 = vmax.f32 %v1005_v12, 0.0 }
  0xd6   : > { %v328_v18 = vpop.f32.mrf.mxu0  ;;  %v546_v19 = vpop.f32.mrf.mxu1 }
  0xd7   : > { %v1092_v22 = vmax.f32 %v849_v16, %v1067_v17  ;;  %1351 = vmatmul.msk.f32.gmra.mxu2 %vm210_vm1, %v1325_v13  ;;  %1402 = vmatmul.msk.f32.gmra.mxu3 %vm210_vm1, %v1376_v14  ;;  %v329_v23 = vadd.f32 %v1622_v10, %v328_v18  ;;  %v547_v24 = vadd.f32 %v1622_v10, %v546_v19 }
  0xd9   : > { %v1117_v25 = vmax.f32 %v631_v15, %v1092_v22  ;;  %v389_v26 = vmax.f32 %v329_v23, 0.0  ;;  %v607_v27 = vmax.f32 %v547_v24, 0.0  ;;  %1249 = vmatmul.msk.f32.gmra.mxu0 %vm210_vm1, %v205_v20  ;;  %1300 = vmatmul.msk.f32.gmra.mxu1 %vm210_vm1, %v1274_v21 }
  0xda   : > { %v789_v28 = vpop.f32.mrf.mxu2  ;;  %v1007_v29 = vpop.f32.mrf.mxu3 }
  0xdb   : > { %1143 = vst.msk [vmem:[%s1648_s17 + $0x30] sm:$0xff] %vm1136_vm2, %v1117_v25  ;;  %v790_v30 = vadd.f32 %v1622_v10, %v789_v28  ;;  %v1008_v31 = vadd.f32 %v1622_v10, %v1007_v29  ;;  %v632_v34 = vmax.f32 %v389_v26, %v607_v27 }
  0xdd   : > { %v850_v35 = vmax.f32 %v790_v30, 0.0  ;;  %v1068_v36 = vmax.f32 %v1008_v31, 0.0 }
  0xde   : > { %v331_v37 = vpop.f32.mrf.mxu0  ;;  %v549_v38 = vpop.f32.mrf.mxu1 }
  0xdf   : > { %v1093_v41 = vmax.f32 %v850_v35, %v1068_v36  ;;  %1352 = vmatmul.msk.f32.gmra.mxu2 %vm210_vm1, %v1326_v32  ;;  %1403 = vmatmul.msk.f32.gmra.mxu3 %vm210_vm1, %v1377_v33  ;;  %v332_v42 = vadd.f32 %v1622_v10, %v331_v37  ;;  %v550_v43 = vadd.f32 %v1622_v10, %v549_v38 }
  0xe1   : > { %v1118_v44 = vmax.f32 %v632_v34, %v1093_v41  ;;  %v390_v45 = vmax.f32 %v332_v42, 0.0  ;;  %v608_v46 = vmax.f32 %v550_v43, 0.0  ;;  %1250 = vmatmul.msk.f32.gmra.mxu0 %vm210_vm1, %v206_v39  ;;  %1301 = vmatmul.msk.f32.gmra.mxu1 %vm210_vm1, %v1275_v40 }
  0xe2   : > { %v792_v47 = vpop.f32.mrf.mxu2  ;;  %v1010_v48 = vpop.f32.mrf.mxu3 }
  0xe3   : > { %1144 = vst.msk [vmem:[%s1648_s17 + $0x38] sm:$0xff] %vm1136_vm2, %v1118_v44  ;;  %v793_v49 = vadd.f32 %v1622_v10, %v792_v47  ;;  %v1011_v50 = vadd.f32 %v1622_v10, %v1010_v48  ;;  %v633_v51 = vmax.f32 %v390_v45, %v608_v46 }
  0xe5   : > { %v851_v52 = vmax.f32 %v793_v49, 0.0  ;;  %v1069_v53 = vmax.f32 %v1011_v50, 0.0 }
  0xe6   : > { %v334_v54 = vpop.f32.mrf.mxu0  ;;  %v552_v55 = vpop.f32.mrf.mxu1 }
  0xe7   : > { %v1094_v56 = vmax.f32 %v851_v52, %v1069_v53  ;;  %v335_v57 = vadd.f32 %v1622_v10, %v334_v54  ;;  %v553_v58 = vadd.f32 %v1622_v10, %v552_v55 }
  0xe9   : > { %v1119_v59 = vmax.f32 %v633_v51, %v1094_v56  ;;  %v391_v60 = vmax.f32 %v335_v57, 0.0  ;;  %v609_v61 = vmax.f32 %v553_v58, 0.0 }
  0xea   : > { %v795_v62 = vpop.f32.mrf.mxu2  ;;  %v1013_v63 = vpop.f32.mrf.mxu3 }
  0xeb   : > { %1145 = vst.msk [vmem:[%s1648_s17 + $0x40] sm:$0xff] %vm1136_vm2, %v1119_v59  ;;  %v796_v0 = vadd.f32 %v1622_v10, %v795_v62  ;;  %v1014_v1 = vadd.f32 %v1622_v10, %v1013_v63  ;;  %v634_v2 = vmax.f32 %v391_v60, %v609_v61 }
  0xed   : > { %v852_v3 = vmax.f32 %v796_v0, 0.0  ;;  %v1070_v4 = vmax.f32 %v1014_v1, 0.0 }
  0xee   : > { %v337_v5 = vpop.f32.mrf.mxu0  ;;  %v555_v6 = vpop.f32.mrf.mxu1 }
  0xef   : > { %v1095_v7 = vmax.f32 %v852_v3, %v1070_v4  ;;  %v338_v8 = vadd.f32 %v1622_v10, %v337_v5  ;;  %v556_v9 = vadd.f32 %v1622_v10, %v555_v6 }
  0xf1   : > { %v1120_v11 = vmax.f32 %v634_v2, %v1095_v7  ;;  %v392_v12 = vmax.f32 %v338_v8, 0.0  ;;  %v610_v13 = vmax.f32 %v556_v9, 0.0 }
  0xf2   : > { %v798_v14 = vpop.f32.mrf.mxu2  ;;  %v1016_v15 = vpop.f32.mrf.mxu3 }
  0xf3   : > { %1146 = vst.msk [vmem:[%s1648_s17 + $0x48] sm:$0xff] %vm1136_vm2, %v1120_v11  ;;  %v799_v16 = vadd.f32 %v1622_v10, %v798_v14  ;;  %v1017_v17 = vadd.f32 %v1622_v10, %v1016_v15  ;;  %v635_v18 = vmax.f32 %v392_v12, %v610_v13 }
  0xf5   : > { %v853_v19 = vmax.f32 %v799_v16, 0.0  ;;  %v1071_v20 = vmax.f32 %v1017_v17, 0.0 }
  0xf6   : > { %v340_v21 = vpop.f32.mrf.mxu0  ;;  %v558_v22 = vpop.f32.mrf.mxu1 }
  0xf7   : > { %v1096_v23 = vmax.f32 %v853_v19, %v1071_v20  ;;  %v341_v24 = vadd.f32 %v1622_v10, %v340_v21  ;;  %v559_v25 = vadd.f32 %v1622_v10, %v558_v22 }
  0xf9   : > { %v1121_v26 = vmax.f32 %v635_v18, %v1096_v23  ;;  %v393_v27 = vmax.f32 %v341_v24, 0.0  ;;  %v611_v28 = vmax.f32 %v559_v25, 0.0 }
  0xfa   : > { %v801_v29 = vpop.f32.mrf.mxu2  ;;  %v1019_v30 = vpop.f32.mrf.mxu3 }
  0xfb   : > { %1147 = vst.msk [vmem:[%s1648_s17 + $0x50] sm:$0xff] %vm1136_vm2, %v1121_v26  ;;  %v802_v31 = vadd.f32 %v1622_v10, %v801_v29  ;;  %v1020_v32 = vadd.f32 %v1622_v10, %v1019_v30  ;;  %v636_v33 = vmax.f32 %v393_v27, %v611_v28 }
  0xfd   : > { %v854_v34 = vmax.f32 %v802_v31, 0.0  ;;  %v1072_v35 = vmax.f32 %v1020_v32, 0.0 }
  0xfe   : > { %v343_v36 = vpop.f32.mrf.mxu0  ;;  %v561_v37 = vpop.f32.mrf.mxu1 }
  0xff   : > { %v1097_v38 = vmax.f32 %v854_v34, %v1072_v35  ;;  %v344_v39 = vadd.f32 %v1622_v10, %v343_v36  ;;  %v562_v40 = vadd.f32 %v1622_v10, %v561_v37 }
 0x101   : > { %v1122_v41 = vmax.f32 %v636_v33, %v1097_v38  ;;  %v394_v42 = vmax.f32 %v344_v39, 0.0  ;;  %v612_v43 = vmax.f32 %v562_v40, 0.0 }
 0x102   : > { %v804_v44 = vpop.f32.mrf.mxu2  ;;  %v1022_v45 = vpop.f32.mrf.mxu3 }
 0x103   : > { %1148 = vst.msk [vmem:[%s1648_s17 + $0x58] sm:$0xff] %vm1136_vm2, %v1122_v41  ;;  %v805_v46 = vadd.f32 %v1622_v10, %v804_v44  ;;  %v1023_v47 = vadd.f32 %v1622_v10, %v1022_v45  ;;  %v637_v48 = vmax.f32 %v394_v42, %v612_v43 }
 0x105   : > { %v855_v49 = vmax.f32 %v805_v46, 0.0  ;;  %v1073_v50 = vmax.f32 %v1023_v47, 0.0 }
 0x106   : > { %v346_v51 = vpop.f32.mrf.mxu0  ;;  %v564_v52 = vpop.f32.mrf.mxu1 }
 0x107   : > { %v1098_v53 = vmax.f32 %v855_v49, %v1073_v50  ;;  %v347_v54 = vadd.f32 %v1622_v10, %v346_v51  ;;  %v565_v55 = vadd.f32 %v1622_v10, %v564_v52 }
 0x109   : > { %v1123_v56 = vmax.f32 %v637_v48, %v1098_v53  ;;  %v395_v57 = vmax.f32 %v347_v54, 0.0  ;;  %v613_v58 = vmax.f32 %v565_v55, 0.0 }
 0x10a   : > { %v807_v59 = vpop.f32.mrf.mxu2  ;;  %v1025_v60 = vpop.f32.mrf.mxu3 }
 0x10b   : > { %1149 = vst.msk [vmem:[%s1648_s17 + $0x60] sm:$0xff] %vm1136_vm2, %v1123_v56  ;;  %v808_v61 = vadd.f32 %v1622_v10, %v807_v59  ;;  %v1026_v62 = vadd.f32 %v1622_v10, %v1025_v60  ;;  %v638_v63 = vmax.f32 %v395_v57, %v613_v58 }
 0x10d   : > { %v856_v0 = vmax.f32 %v808_v61, 0.0  ;;  %v1074_v1 = vmax.f32 %v1026_v62, 0.0 }
 0x10e   : > { %v349_v2 = vpop.f32.mrf.mxu0  ;;  %v567_v3 = vpop.f32.mrf.mxu1 }
 0x10f   : > { %v1099_v4 = vmax.f32 %v856_v0, %v1074_v1  ;;  %v350_v5 = vadd.f32 %v1622_v10, %v349_v2  ;;  %v568_v6 = vadd.f32 %v1622_v10, %v567_v3 }
 0x111   : > { %v1124_v7 = vmax.f32 %v638_v63, %v1099_v4  ;;  %v396_v8 = vmax.f32 %v350_v5, 0.0  ;;  %v614_v9 = vmax.f32 %v568_v6, 0.0 }
 0x112   : > { %v810_v11 = vpop.f32.mrf.mxu2  ;;  %v1028_v12 = vpop.f32.mrf.mxu3 }
 0x113   : > { %1150 = vst.msk [vmem:[%s1648_s17 + $0x68] sm:$0xff] %vm1136_vm2, %v1124_v7  ;;  %v811_v13 = vadd.f32 %v1622_v10, %v810_v11  ;;  %v1029_v14 = vadd.f32 %v1622_v10, %v1028_v12  ;;  %v639_v15 = vmax.f32 %v396_v8, %v614_v9 }
 0x115   : > { %v857_v16 = vmax.f32 %v811_v13, 0.0  ;;  %v1075_v17 = vmax.f32 %v1029_v14, 0.0 }
 0x116   : > { %v352_v18 = vpop.f32.mrf.mxu0  ;;  %v570_v19 = vpop.f32.mrf.mxu1 }
 0x117   : > { %v1100_v20 = vmax.f32 %v857_v16, %v1075_v17  ;;  %v353_v21 = vadd.f32 %v1622_v10, %v352_v18  ;;  %v571_v22 = vadd.f32 %v1622_v10, %v570_v19 }
 0x119   : > { %v1125_v23 = vmax.f32 %v639_v15, %v1100_v20  ;;  %v397_v24 = vmax.f32 %v353_v21, 0.0  ;;  %v615_v25 = vmax.f32 %v571_v22, 0.0 }
 0x11a   : > { %v813_v26 = vpop.f32.mrf.mxu2  ;;  %v1031_v27 = vpop.f32.mrf.mxu3 }
 0x11b   : > { %1151 = vst.msk [vmem:[%s1648_s17 + $0x70] sm:$0xff] %vm1136_vm2, %v1125_v23  ;;  %v814_v28 = vadd.f32 %v1622_v10, %v813_v26  ;;  %v1032_v29 = vadd.f32 %v1622_v10, %v1031_v27  ;;  %v640_v30 = vmax.f32 %v397_v24, %v615_v25 }
 0x11d   : > { %v858_v31 = vmax.f32 %v814_v28, 0.0  ;;  %v1076_v32 = vmax.f32 %v1032_v29, 0.0 }
 0x11e   : > { %v355_v33 = vpop.f32.mrf.mxu0  ;;  %v573_v34 = vpop.f32.mrf.mxu1 }
 0x11f   : > { %v1101_v35 = vmax.f32 %v858_v31, %v1076_v32  ;;  %v356_v36 = vadd.f32 %v1622_v10, %v355_v33  ;;  %v574_v37 = vadd.f32 %v1622_v10, %v573_v34 }
 0x121   : > { %v1126_v38 = vmax.f32 %v640_v30, %v1101_v35  ;;  %v398_v39 = vmax.f32 %v356_v36, 0.0  ;;  %v616_v40 = vmax.f32 %v574_v37, 0.0 }
 0x122   : > { %v816_v41 = vpop.f32.mrf.mxu2  ;;  %v1034_v42 = vpop.f32.mrf.mxu3 }
 0x123   : > { %1152 = vst.msk [vmem:[%s1648_s17 + $0x78] sm:$0xff] %vm1136_vm2, %v1126_v38  ;;  %v817_v43 = vadd.f32 %v1622_v10, %v816_v41  ;;  %v1035_v44 = vadd.f32 %v1622_v10, %v1034_v42  ;;  %v641_v45 = vmax.f32 %v398_v39, %v616_v40 }
 0x125   : > { %v859_v46 = vmax.f32 %v817_v43, 0.0  ;;  %v1077_v47 = vmax.f32 %v1035_v44, 0.0 }
 0x126   : > { %v358_v48 = vpop.f32.mrf.mxu0  ;;  %v576_v49 = vpop.f32.mrf.mxu1 }
 0x127   : > { %v1102_v50 = vmax.f32 %v859_v46, %v1077_v47  ;;  %v359_v51 = vadd.f32 %v1622_v10, %v358_v48  ;;  %v577_v52 = vadd.f32 %v1622_v10, %v576_v49 }
 0x129   : > { %v1127_v53 = vmax.f32 %v641_v45, %v1102_v50  ;;  %v399_v54 = vmax.f32 %v359_v51, 0.0  ;;  %v617_v55 = vmax.f32 %v577_v52, 0.0 }
 0x12a   : > { %v819_v56 = vpop.f32.mrf.mxu2  ;;  %v1037_v57 = vpop.f32.mrf.mxu3 }
 0x12b   : > { %1153 = vst.msk [vmem:[%s1648_s17 + $0x80] sm:$0xff] %vm1136_vm2, %v1127_v53  ;;  %v820_v58 = vadd.f32 %v1622_v10, %v819_v56  ;;  %v1038_v59 = vadd.f32 %v1622_v10, %v1037_v57  ;;  %v642_v60 = vmax.f32 %v399_v54, %v617_v55 }
 0x12d   : > { %v860_v61 = vmax.f32 %v820_v58, 0.0  ;;  %v1078_v62 = vmax.f32 %v1038_v59, 0.0 }
 0x12e   : > { %v361_v63 = vpop.f32.mrf.mxu0  ;;  %v579_v0 = vpop.f32.mrf.mxu1 }
 0x12f   : > { %v1103_v1 = vmax.f32 %v860_v61, %v1078_v62  ;;  %v362_v2 = vadd.f32 %v1622_v10, %v361_v63  ;;  %v580_v3 = vadd.f32 %v1622_v10, %v579_v0 }
 0x131   : > { %v1128_v4 = vmax.f32 %v642_v60, %v1103_v1  ;;  %v400_v5 = vmax.f32 %v362_v2, 0.0  ;;  %v618_v6 = vmax.f32 %v580_v3, 0.0 }
 0x132   : > { %v822_v7 = vpop.f32.mrf.mxu2  ;;  %v1040_v8 = vpop.f32.mrf.mxu3 }
 0x133   : > { %1154 = vst.msk [vmem:[%s1648_s17 + $0x88] sm:$0xff] %vm1136_vm2, %v1128_v4  ;;  %v823_v9 = vadd.f32 %v1622_v10, %v822_v7  ;;  %v1041_v11 = vadd.f32 %v1622_v10, %v1040_v8  ;;  %v643_v12 = vmax.f32 %v400_v5, %v618_v6 }
 0x135   : > { %v861_v13 = vmax.f32 %v823_v9, 0.0  ;;  %v1079_v14 = vmax.f32 %v1041_v11, 0.0 }
 0x136   : > { %v364_v15 = vpop.f32.mrf.mxu0  ;;  %v582_v16 = vpop.f32.mrf.mxu1 }
 0x137   : > { %v1104_v17 = vmax.f32 %v861_v13, %v1079_v14  ;;  %v365_v18 = vadd.f32 %v1622_v10, %v364_v15  ;;  %v583_v19 = vadd.f32 %v1622_v10, %v582_v16 }
 0x139   : > { %v1129_v20 = vmax.f32 %v643_v12, %v1104_v17  ;;  %v401_v21 = vmax.f32 %v365_v18, 0.0  ;;  %v619_v22 = vmax.f32 %v583_v19, 0.0 }
 0x13a   : > { %v825_v23 = vpop.f32.mrf.mxu2  ;;  %v1043_v24 = vpop.f32.mrf.mxu3 }
 0x13b   : > { %1155 = vst.msk [vmem:[%s1648_s17 + $0x90] sm:$0xff] %vm1136_vm2, %v1129_v20  ;;  %v826_v25 = vadd.f32 %v1622_v10, %v825_v23  ;;  %v1044_v26 = vadd.f32 %v1622_v10, %v1043_v24  ;;  %v644_v27 = vmax.f32 %v401_v21, %v619_v22 }
 0x13d   : > { %v862_v28 = vmax.f32 %v826_v25, 0.0  ;;  %v1080_v29 = vmax.f32 %v1044_v26, 0.0 }
 0x13e   : > { %v367_v30 = vpop.f32.mrf.mxu0  ;;  %v585_v31 = vpop.f32.mrf.mxu1 }
 0x13f   : > { %v1105_v32 = vmax.f32 %v862_v28, %v1080_v29  ;;  %v368_v33 = vadd.f32 %v1622_v10, %v367_v30  ;;  %v586_v34 = vadd.f32 %v1622_v10, %v585_v31 }
 0x141   : > { %v1130_v35 = vmax.f32 %v644_v27, %v1105_v32  ;;  %v402_v36 = vmax.f32 %v368_v33, 0.0  ;;  %v620_v37 = vmax.f32 %v586_v34, 0.0 }
 0x142   : > { %v828_v38 = vpop.f32.mrf.mxu2  ;;  %v1046_v39 = vpop.f32.mrf.mxu3 }
 0x143   : > { %1156 = vst.msk [vmem:[%s1648_s17 + $0x98] sm:$0xff] %vm1136_vm2, %v1130_v35  ;;  %v829_v40 = vadd.f32 %v1622_v10, %v828_v38  ;;  %v1047_v41 = vadd.f32 %v1622_v10, %v1046_v39  ;;  %v645_v42 = vmax.f32 %v402_v36, %v620_v37 }
 0x145   : > { %v863_v43 = vmax.f32 %v829_v40, 0.0  ;;  %v1081_v44 = vmax.f32 %v1047_v41, 0.0 }
 0x146   : > { %v370_v45 = vpop.f32.mrf.mxu0  ;;  %v588_v46 = vpop.f32.mrf.mxu1 }
 0x147   : > { %v1106_v47 = vmax.f32 %v863_v43, %v1081_v44  ;;  %v371_v48 = vadd.f32 %v1622_v10, %v370_v45  ;;  %v589_v49 = vadd.f32 %v1622_v10, %v588_v46 }
 0x149   : > { %v1131_v50 = vmax.f32 %v645_v42, %v1106_v47  ;;  %v403_v51 = vmax.f32 %v371_v48, 0.0  ;;  %v621_v52 = vmax.f32 %v589_v49, 0.0 }
 0x14a   : > { %v831_v53 = vpop.f32.mrf.mxu2  ;;  %v1049_v54 = vpop.f32.mrf.mxu3 }
 0x14b   : > { %1157 = vst.msk [vmem:[%s1648_s17 + $0xa0] sm:$0xff] %vm1136_vm2, %v1131_v50  ;;  %v832_v55 = vadd.f32 %v1622_v10, %v831_v53  ;;  %v1050_v56 = vadd.f32 %v1622_v10, %v1049_v54  ;;  %v646_v57 = vmax.f32 %v403_v51, %v621_v52 }
 0x14d   : > { %v864_v58 = vmax.f32 %v832_v55, 0.0  ;;  %v1082_v59 = vmax.f32 %v1050_v56, 0.0 }
 0x14e   : > { %v373_v60 = vpop.f32.mrf.mxu0  ;;  %v591_v61 = vpop.f32.mrf.mxu1 }
 0x14f   : > { %v1107_v62 = vmax.f32 %v864_v58, %v1082_v59  ;;  %v374_v63 = vadd.f32 %v1622_v10, %v373_v60  ;;  %v592_v0 = vadd.f32 %v1622_v10, %v591_v61 }
 0x151   : > { %v1132_v1 = vmax.f32 %v646_v57, %v1107_v62  ;;  %v404_v2 = vmax.f32 %v374_v63, 0.0  ;;  %v622_v3 = vmax.f32 %v592_v0, 0.0 }
 0x152   : > { %v834_v4 = vpop.f32.mrf.mxu2  ;;  %v1052_v5 = vpop.f32.mrf.mxu3 }
 0x153   : > { %1158 = vst.msk [vmem:[%s1648_s17 + $0xa8] sm:$0xff] %vm1136_vm2, %v1132_v1  ;;  %v835_v6 = vadd.f32 %v1622_v10, %v834_v4  ;;  %v1053_v7 = vadd.f32 %v1622_v10, %v1052_v5  ;;  %v647_v8 = vmax.f32 %v404_v2, %v622_v3 }
 0x155   : > { %v865_v9 = vmax.f32 %v835_v6, 0.0  ;;  %v1083_v11 = vmax.f32 %v1053_v7, 0.0 }
 0x156   : > { %v376_v12 = vpop.f32.mrf.mxu0  ;;  %v594_v13 = vpop.f32.mrf.mxu1 }
 0x157   : > { %v1108_v14 = vmax.f32 %v865_v9, %v1083_v11  ;;  %v377_v15 = vadd.f32 %v1622_v10, %v376_v12  ;;  %v595_v16 = vadd.f32 %v1622_v10, %v594_v13 }
 0x159   : > { %v1133_v17 = vmax.f32 %v647_v8, %v1108_v14  ;;  %v405_v18 = vmax.f32 %v377_v15, 0.0  ;;  %v623_v19 = vmax.f32 %v595_v16, 0.0 }
 0x15a   : > { %v837_v20 = vpop.f32.mrf.mxu2  ;;  %v1055_v21 = vpop.f32.mrf.mxu3 }
 0x15b   : > { %1159 = vst.msk [vmem:[%s1648_s17 + $0xb0] sm:$0xff] %vm1136_vm2, %v1133_v17  ;;  %v838_v22 = vadd.f32 %v1622_v10, %v837_v20  ;;  %v1056_v23 = vadd.f32 %v1622_v10, %v1055_v21  ;;  %v648_v24 = vmax.f32 %v405_v18, %v623_v19 }
 0x15d   : > { %v866_v25 = vmax.f32 %v838_v22, 0.0  ;;  %v1084_v26 = vmax.f32 %v1056_v23, 0.0 }
 0x15e   : > { %v379_v27 = vpop.f32.mrf.mxu0  ;;  %v597_v28 = vpop.f32.mrf.mxu1 }
 0x15f   : > { %v1109_v29 = vmax.f32 %v866_v25, %v1084_v26  ;;  %v380_v30 = vadd.f32 %v1622_v10, %v379_v27  ;;  %v598_v31 = vadd.f32 %v1622_v10, %v597_v28 }
 0x161   : > { %v1134_v32 = vmax.f32 %v648_v24, %v1109_v29  ;;  %v406_v33 = vmax.f32 %v380_v30, 0.0  ;;  %v624_v34 = vmax.f32 %v598_v31, 0.0 }
 0x162   : > { %v840_v35 = vpop.f32.mrf.mxu2  ;;  %v1058_v36 = vpop.f32.mrf.mxu3 }
 0x163   : > { %1160 = vst.msk [vmem:[%s1648_s17 + $0xb8] sm:$0xff] %vm1136_vm2, %v1134_v32  ;;  %v841_v37 = vadd.f32 %v1622_v10, %v840_v35  ;;  %v1059_v38 = vadd.f32 %v1622_v10, %v1058_v36  ;;  %v649_v39 = vmax.f32 %v406_v33, %v624_v34 }
 0x165   : > { %v867_v40 = vmax.f32 %v841_v37, 0.0  ;;  %v1085_v41 = vmax.f32 %v1059_v38, 0.0 }
 0x167   : > { %v1110_v42 = vmax.f32 %v867_v40, %v1085_v41 }
 0x169   : > { %v1135_v43 = vmax.f32 %v649_v39, %v1110_v42 }
 0x16b   : > { %1162 = vst.msk [vmem:[%s1648_s17 + $0xc0] sm:$0xf] %vm1161_vm3, %v1135_v43 }
 0x16c PF: > { %s13_s12 = sadd.s32 1, %s1423_s12  }
 0x16d   : > { %p10_p4 = scmp.ge.s32.totalorder %s13_s12, 4  }
 0x16f   :  { %12 = sbr.rel (!%p10_p4) target bundleno = 1 (0x1), region = 65 }

// kernel: net_forward.4
= control target key start
LH: loop header
LB: loop body
LE: loop exit
PB: predicated region body
PF: predicated region fallthrough
CT: control target
= control target key end

     0   :  { %s716_s12 = smov 0   ;;  %s1021_s0 = inlined_call_operand.vmem [shape: f32[2,4,25,150], index: 0, kind: input, shape index: {}]   ;;  %s1022_s1 = inlined_call_operand.vmem [shape: f32[150,16], index: 1, kind: input, shape index: {}]   ;;  %s1023_s2 = inlined_call_operand.vmem [shape: f32[1,16], index: 2, kind: input, shape index: {}]   ;;  %s1024_s3 = inlined_call_operand.vmem [shape: f32[2,25,16], index: 3, kind: output, shape index: {}]  }
   0x1 LB: > { %s603_s13 = sadd.s32 4294967295, %s694_s12   ;;  %p607_p0 = scmp.ge.s32.totalorder %s694_s12, 1  ;;  %s694_s12 = sphi %s716_s12, %s13_s12  }
   0x2   : > { %p137_p1 = scmp.lt.s32.totalorder %s694_s12, 3 }
   0x4   : > { %p138_p2 = pnand %p607_p0, %p137_p1 }
   0x5   : > { %p161_p3 = scmp.lt.s32.totalorder (!%p138_p2), %s603_s13, 1 }
   0x6   : > { %141 = sbr.rel (%p138_p2) target bundleno = 234 (0xea), region = 32 }
   0xb   : > { %v727_v0 = vld [vmem:[%s1022_s1 + $0x78] sm:$0xff]  ;;  %v732_v1 = vld [vmem:[%s1022_s1 + $0x90] sm:$0x3f]  ;;  %vm215_vm0 = vcmask 1045504   ;;  %v744_v3 = vld [vmem:[%s1022_s1 + $0x88] sm:$0xff]  ;;  %s1026_s13 = smov (!%p161_p3, %s603_s13), 1 }
   0xc   : > { %v737_v2 = vld [vmem:[%s1022_s1 + $0x70] sm:$0xff]  ;;  %219 = vmatpush.msra.mxu0 %v727_v0  ;;  %302 = vmatpush.msra.mxu2 %v727_v0  ;;  %v751_v4 = vld [vmem:[%s1022_s1 + $0x68] sm:$0xff]  ;;  %v762_v5 = vld [vmem:[%s1022_s1 + $0x80] sm:$0xff]  ;;  %s658_s28 = sshll.u32 %s1026_s13, 8  ;;  %vm202_vm1 = vcmask 179200   ;;  %s659_s6 = sshll.u32 %s1026_s13, 5 }
   0xd   : > { %625 = vmatpush.msk.msra.mxu3 %vm215_vm0, %v732_v1  ;;  %612 = vmatpush.msk.msra.mxu1 %vm215_vm0, %v732_v1  ;;  %v768_v6 = vld [vmem:[%s1022_s1 + $0x60] sm:$0xff]  ;;  %s777_s4 = scalar_lea.vmem %s1021_s0, %s658_s28  ;;  %v784_v8 = vld [vmem:[%s1022_s1 + $0x58] sm:$0xff]  ;;  %v794_v10 = vld [vmem:[%s1022_s1 + $0x50] sm:$0xff]  ;;  %s1000_s9 = scalar_lea.vmem %s1024_s3, %s659_s6  ;;  %vm542_vm2 = vcmask 130048   ;;  %vm546_vm3 = vcmask 122880  }
   0xe   : > { %220 = vmatpush.msra.mxu0 %v737_v2  ;;  %303 = vmatpush.msra.mxu2 %v737_v2  ;;  %v618_v7 = vld [vmem:[%s777_s4 + $0x48] sm:$0xff]  ;;  %v813_v12 = vld [vmem:[%s1022_s1 + $0x40] sm:$0xff]  ;;  %v620_v13 = vld [vmem:[%s777_s4 + $0x58] sm:$0xff] }
   0xf   : > { %345 = vmatpush.msra.mxu3 %v744_v3  ;;  %262 = vmatpush.msra.mxu1 %v744_v3  ;;  %v192_v9 = vld [vmem:[%s777_s4 + $0x8] sm:$0xff]  ;;  %v823_v14 = vld [vmem:[%s1022_s1 + $0x38] sm:$0xff]  ;;  %v834_v16 = vld [vmem:[%s1022_s1 + $0x30] sm:$0xff] }
  0x10   : > { %221 = vmatpush.msra.mxu0 %v751_v4  ;;  %304 = vmatpush.msra.mxu2 %v751_v4  ;;  %v803_v11 = vld [vmem:[%s1022_s1 + $0x48] sm:$0xff]  ;;  %v194_v15 = vld [vmem:[%s777_s4 + $0x18] sm:$0xff]  ;;  %v852_v18 = vld [vmem:[%s1022_s1 + $0x20] sm:$0xff] }
  0x11   : > { %346 = vmatpush.msra.mxu3 %v762_v5  ;;  %263 = vmatpush.msra.mxu1 %v762_v5  ;;  %v842_v17 = vld [vmem:[%s1022_s1 + $0x28] sm:$0xff]  ;;  %v862_v20 = vld [vmem:[%s1022_s1 + $0x18] sm:$0xff]  ;;  %v872_v21 = vld [vmem:[%s1022_s1 + $0x10] sm:$0xff] }
  0x12   : > { %222 = vmatpush.msra.mxu0 %v768_v6  ;;  %305 = vmatpush.msra.mxu2 %v768_v6  ;;  %v622_v19 = vld [vmem:[%s777_s4 + $0x68] sm:$0xff]  ;;  %v890_v24 = vld [vmem:[%s1022_s1] sm:$0xff]  ;;  %v624_v25 = vld [vmem:[%s777_s4 + $0x78] sm:$0x1] }
  0x13   : > { %626 = vmatmul.msk.f32.vlgmr.msra.gmra.mxu3 %vm202_vm1, %v618_v7  ;;  %613 = vmatmul.msk.f32.vlgmr.msra.gmra.mxu1 %vm202_vm1, %v192_v9  ;;  %v196_v22 = vld [vmem:[%s777_s4 + $0x28] sm:$0xff]  ;;  %v191_v26 = vld [vmem:[%s777_s4] sm:$0xff]  ;;  %v198_v28 = vld [vmem:[%s777_s4 + $0x38] sm:$0x1] }
  0x14   : > { %223 = vmatpush.msra.mxu0 %v784_v8  ;;  %306 = vmatpush.msra.mxu2 %v784_v8  ;;  %v881_v23 = vld [vmem:[%s1022_s1 + $0x8] sm:$0xff]  ;;  %v617_v27 = vld [vmem:[%s777_s4 + $0x40] sm:$0xff]  ;;  %v193_v30 = vld [vmem:[%s777_s4 + $0x10] sm:$0xff] }
  0x15   : > { %389 = vmatpush.msrb.mxu1 %v727_v0  ;;  %638 = vmatpush.msk.msrb.mxu3 %vm215_vm0, %v732_v1  ;;  %v631_v29 = vld [vmem:[%s777_s4 + $0x88] sm:$0xff]  ;;  %v619_v31 = vld [vmem:[%s777_s4 + $0x50] sm:$0xff]  ;;  %v630_v32 = vld [vmem:[%s777_s4 + $0x80] sm:$0xff] }
  0x16   : > { %224 = vmatpush.msra.mxu0 %v794_v10  ;;  %307 = vmatpush.msra.mxu2 %v794_v10  ;;  %v633_v33 = vld [vmem:[%s777_s4 + $0x98] sm:$0xff]  ;;  %v195_v34 = vld [vmem:[%s777_s4 + $0x20] sm:$0xff]  ;;  %v632_v36 = vld [vmem:[%s777_s4 + $0x90] sm:$0xff] }
  0x17   : > { %390 = vmatpush.msrb.mxu1 %v737_v2  ;;  %432 = vmatpush.msrb.mxu3 %v744_v3  ;;  %v621_v35 = vld [vmem:[%s777_s4 + $0x60] sm:$0xff]  ;;  %v635_v37 = vld [vmem:[%s777_s4 + $0xa8] sm:$0xff]  ;;  %v197_v38 = vld [vmem:[%s777_s4 + $0x30] sm:$0x1] }
  0x18   : > { %225 = vmatpush.msra.mxu0 %v803_v11  ;;  %308 = vmatpush.msra.mxu2 %v803_v11  ;;  %v623_v39 = vld [vmem:[%s777_s4 + $0x70] sm:$0x1]  ;;  %v634_v40 = vld [vmem:[%s777_s4 + $0xa0] sm:$0xff]  ;;  %v637_v41 = vld [vmem:[%s777_s4 + $0xb8] sm:$0x1] }
  0x19   : > { %391 = vmatpush.msrb.mxu1 %v751_v4  ;;  %433 = vmatpush.msrb.mxu3 %v762_v5  ;;  %v644_v42 = vld [vmem:[%s777_s4 + $0xc8] sm:$0xff]  ;;  %v636_v43 = vld [vmem:[%s777_s4 + $0xb0] sm:$0x1]  ;;  %v643_v44 = vld [vmem:[%s777_s4 + $0xc0] sm:$0xff] }
  0x1a   : > { %226 = vmatpush.msra.mxu0 %v813_v12  ;;  %309 = vmatpush.msra.mxu2 %v813_v12  ;;  %v650_v45 = vld [vmem:[%s777_s4 + $0xf8] sm:$0x1]  ;;  %v649_v47 = vld [vmem:[%s777_s4 + $0xf0] sm:$0x1]  ;;  %v648_v49 = vld [vmem:[%s777_s4 + $0xe8] sm:$0xff] }
  0x1b   : > { %627 = vmatmul.msk.f32.gmra.mxu3 %vm202_vm1, %v620_v13  ;;  %392 = vmatpush.msrb.mxu1 %v768_v6  ;;  %v646_v46 = vld [vmem:[%s777_s4 + $0xd8] sm:$0xff]  ;;  %v645_v48 = vld [vmem:[%s777_s4 + $0xd0] sm:$0xff]  ;;  %v647_v50 = vld [vmem:[%s777_s4 + $0xe0] sm:$0xff] }
  0x1c   : > { %227 = vmatpush.msra.mxu0 %v823_v14  ;;  %310 = vmatpush.msra.mxu2 %v823_v14  ;;  %v982_v7 = vld [vmem:[%s1023_s2] ss:$0 sm:$0xff] }
  0x1d   : > { %614 = vmatmul.msk.f32.gmra.mxu1 %vm202_vm1, %v194_v15  ;;  %676 = vmatpush.msk.msra.mxu3 %vm215_vm0, %v732_v1 }
  0x1e   : > { %228 = vmatpush.msra.mxu0 %v834_v16  ;;  %311 = vmatpush.msra.mxu2 %v834_v16 }
  0x1f   : > { %393 = vmatpush.msrb.mxu1 %v784_v8  ;;  %677 = vmatpush.msra.mxu3 %v744_v3 }
  0x20   : > { %229 = vmatpush.msra.mxu0 %v842_v17  ;;  %312 = vmatpush.msra.mxu2 %v842_v17 }
  0x21   : > { %394 = vmatpush.msrb.mxu1 %v794_v10  ;;  %678 = vmatpush.msra.mxu3 %v762_v5 }
  0x22   : > { %230 = vmatpush.msra.mxu0 %v852_v18  ;;  %313 = vmatpush.msra.mxu2 %v852_v18 }
  0x23   : > { %628 = vmatmul.msk.f32.gmra.mxu3 %vm202_vm1, %v622_v19  ;;  %395 = vmatpush.msrb.mxu1 %v803_v11 }
  0x24   : > { %231 = vmatpush.msra.mxu0 %v862_v20  ;;  %314 = vmatpush.msra.mxu2 %v862_v20 }
  0x25   : > { %396 = vmatpush.msrb.mxu1 %v813_v12 }
  0x26   : > { %232 = vmatpush.msra.mxu0 %v872_v21  ;;  %615 = vmatmul.msk.f32.gmra.mxu1 %vm202_vm1, %v196_v22 }
  0x27   : > { %315 = vmatpush.msra.mxu2 %v872_v21  ;;  %397 = vmatpush.msrb.mxu1 %v823_v14 }
  0x28   : > { %233 = vmatpush.msra.mxu0 %v881_v23 }
  0x29   : > { %316 = vmatpush.msra.mxu2 %v881_v23  ;;  %398 = vmatpush.msrb.mxu1 %v834_v16 }
  0x2a   : > { %234 = vmatpush.msra.mxu0 %v890_v24 }
  0x2b   : > { %317 = vmatpush.msra.mxu2 %v890_v24  ;;  %629 = vmatmul.msk.f32.gmra.mxu3 %vm202_vm1, %v624_v25 }
  0x2c   : > { %235 = vmatmul.f32.vlgmr.msra.gmra.mxu0 %v191_v26  ;;  %318 = vmatmul.f32.vlgmr.msra.gmra.mxu2 %v617_v27 }
  0x2d   : > { %399 = vmatpush.msrb.mxu1 %v842_v17  ;;  %651 = vmatpush.msk.msrb.mxu2 %vm215_vm0, %v732_v1 }
  0x2e   : > { %616 = vmatmul.msk.f32.gmra.mxu1 %vm202_vm1, %v198_v28  ;;  %472 = vmatpush.msrb.mxu0 %v727_v0 }
  0x2f   : > { %400 = vmatpush.msrb.mxu1 %v852_v18  ;;  %515 = vmatpush.msrb.mxu2 %v744_v3 }
  0x30   : > { %473 = vmatpush.msrb.mxu0 %v737_v2 }
  0x31   : > { %401 = vmatpush.msrb.mxu1 %v862_v20  ;;  %516 = vmatpush.msrb.mxu2 %v762_v5 }
  0x32   : > { %474 = vmatpush.msrb.mxu0 %v751_v4 }
  0x33   : > { %402 = vmatpush.msrb.mxu1 %v872_v21  ;;  %639 = vmatmul.msk.f32.vlgmr.msrb.gmra.mxu3 %vm202_vm1, %v631_v29 }
  0x34   : > { %238 = vmatmul.f32.gmra.mxu0 %v193_v30  ;;  %321 = vmatmul.f32.gmra.mxu2 %v619_v31 }
  0x35   : > { %403 = vmatpush.msrb.mxu1 %v881_v23  ;;  %475 = vmatpush.msrb.mxu0 %v768_v6 }
  0x37   : > { %404 = vmatpush.msrb.mxu1 %v890_v24  ;;  %476 = vmatpush.msrb.mxu0 %v784_v8 }
  0x38   : > { %405 = vmatmul.f32.vlgmr.msrb.gmra.mxu1 %v630_v32 }
  0x39   : > { %660 = vmatpush.msra.mxu1 %v727_v0  ;;  %477 = vmatpush.msrb.mxu0 %v794_v10 }
  0x3b   : > { %661 = vmatpush.msra.mxu1 %v737_v2  ;;  %640 = vmatmul.msk.f32.gmra.mxu3 %vm202_vm1, %v633_v33 }
  0x3c   : > { %241 = vmatmul.f32.gmra.mxu0 %v195_v34  ;;  %324 = vmatmul.f32.gmra.mxu2 %v621_v35 }
  0x3d   : > { %662 = vmatpush.msra.mxu1 %v751_v4  ;;  %478 = vmatpush.msrb.mxu0 %v803_v11 }
  0x3f   : > { %663 = vmatpush.msra.mxu1 %v768_v6  ;;  %479 = vmatpush.msrb.mxu0 %v813_v12 }
  0x40   : > { %408 = vmatmul.f32.gmra.mxu1 %v632_v36 }
  0x41   : > { %664 = vmatpush.msra.mxu1 %v784_v8  ;;  %480 = vmatpush.msrb.mxu0 %v823_v14 }
  0x43   : > { %665 = vmatpush.msra.mxu1 %v794_v10  ;;  %481 = vmatpush.msrb.mxu0 %v834_v16 }
  0x44   : > { %641 = vmatmul.msk.f32.gmra.mxu3 %vm202_vm1, %v635_v37  ;;  %244 = vmatmul.f32.gmra.mxu0 %v197_v38 }
  0x45   : > { %327 = vmatmul.f32.gmra.mxu2 %v623_v39  ;;  %666 = vmatpush.msra.mxu1 %v803_v11 }
  0x46   : > { %482 = vmatpush.msrb.mxu0 %v842_v17 }
  0x47   : > { %667 = vmatpush.msra.mxu1 %v813_v12 }
  0x48   : > { %483 = vmatpush.msrb.mxu0 %v852_v18  ;;  %411 = vmatmul.f32.gmra.mxu1 %v634_v40 }
  0x49   : > { %668 = vmatpush.msra.mxu1 %v823_v14 }
  0x4a   : > { %484 = vmatpush.msrb.mxu0 %v862_v20 }
  0x4b   : > { %669 = vmatpush.msra.mxu1 %v834_v16 }
  0x4c   : > { %485 = vmatpush.msrb.mxu0 %v872_v21  ;;  %642 = vmatmul.msk.f32.gmra.mxu3 %vm202_vm1, %v637_v41 }
  0x4d   : > { %670 = vmatpush.msra.mxu1 %v842_v17  ;;  %652 = vmatmul.msk.f32.vlgmr.msrb.gmra.mxu2 %vm202_vm1, %v644_v42 }
  0x4e   : > { %486 = vmatpush.msrb.mxu0 %v881_v23 }
  0x4f   : > { %671 = vmatpush.msra.mxu1 %v852_v18 }
  0x50   : > { %487 = vmatpush.msrb.mxu0 %v890_v24  ;;  %414 = vmatmul.f32.gmra.mxu1 %v636_v43 }
  0x51   : > { %672 = vmatpush.msra.mxu1 %v862_v20  ;;  %488 = vmatmul.f32.vlgmr.msrb.gmra.mxu0 %v643_v44 }
  0x53   : > { %673 = vmatpush.msra.mxu1 %v872_v21 }
  0x54   : > { %655 = vmatmul.msk.f32.vlgmr.msra.gmra.mxu3 %vm202_vm1, %v650_v45 }
  0x55   : > { %674 = vmatpush.msra.mxu1 %v881_v23  ;;  %653 = vmatmul.msk.f32.gmra.mxu2 %vm202_vm1, %v646_v46 }
  0x57   : > { %675 = vmatpush.msra.mxu1 %v890_v24 }
  0x58   : > { %497 = vmatmul.f32.vlgmr.msra.gmra.mxu1 %v649_v47 }
  0x59   : > { %491 = vmatmul.f32.gmra.mxu0 %v645_v48 }
  0x5d   : > { %654 = vmatmul.msk.f32.gmra.mxu2 %vm202_vm1, %v648_v49 }
  0x61   : > { %494 = vmatmul.f32.gmra.mxu0 %v647_v50 }
  0x90   : > { %v265_v51 = vpop.f32.mrf.mxu1 }
  0x96   : > { %v348_v52 = vpop.f32.mrf.mxu3 }
  0x9a   : > { %v268_v53 = vpop.f32.mrf.mxu1 }
  0x9e   : > { %v351_v54 = vpop.f32.mrf.mxu3 }
  0xa3   : > { %v975_v55 = vpop.f32.mrf.mxu1 }
  0xa6   : > { %v977_v56 = vpop.f32.mrf.mxu3 }
  0xa9   : > { %v236_v57 = vpop.f32.mrf.mxu0 }
  0xaa   : > { %v237_v11 = vadd.f32 %v982_v7, %v236_v57 }
  0xab   : > { %v274_v58 = vpop.f32.mrf.mxu1 }
  0xac   : > { %v266_v16 = vadd.f32 %v265_v51, %v237_v11 }
  0xae   : > { %v357_v59 = vpop.f32.mrf.mxu3  ;;  %v277_v28 = vmax.f32 %v266_v16, 0.0 }
  0xaf   : > { %v319_v60 = vpop.f32.mrf.mxu2 }
  0xb0   : > { %v320_v10 = vadd.f32 %v982_v7, %v319_v60 }
  0xb1   : > { %v239_v61 = vpop.f32.mrf.mxu0 }
  0xb2   : > { %v349_v13 = vadd.f32 %v348_v52, %v320_v10  ;;  %v240_v26 = vadd.f32 %v982_v7, %v239_v61 }
  0xb4   : > { %v360_v23 = vmax.f32 %v349_v13, 0.0  ;;  %v269_v38 = vadd.f32 %v268_v53, %v240_v26 }
  0xb5   : > { %v406_v62 = vpop.f32.mrf.mxu1 }
  0xb6   : > { %v435_v63 = vpop.f32.mrf.mxu3  ;;  %v407_v12 = vadd.f32 %v982_v7, %v406_v62  ;;  %v364_v34 = vmax.f32 %v277_v28, %v360_v23  ;;  %v278_v53 = vmax.f32 %v269_v38, 0.0 }
  0xb7   : > { %v322_v0 = vpop.f32.mrf.mxu2 }
  0xb8   : > { %v436_v17 = vadd.f32 %v435_v63, %v407_v12  ;;  %v323_v24 = vadd.f32 %v982_v7, %v322_v0 }
  0xb9   : > { %v242_v1 = vpop.f32.mrf.mxu0 }
  0xba   : > { %v447_v29 = vmax.f32 %v436_v17, 0.0  ;;  %v352_v35 = vadd.f32 %v351_v54, %v323_v24 }
  0xbc   : > { %v361_v50 = vmax.f32 %v352_v35, 0.0 }
  0xbd   : > { %v409_v2 = vpop.f32.mrf.mxu1 }
  0xbe   : > { %v438_v3 = vpop.f32.mrf.mxu3  ;;  %v410_v30 = vadd.f32 %v982_v7, %v409_v2  ;;  %v365_v0 = vmax.f32 %v278_v53, %v361_v50 }
  0xbf   : > { %v325_v4 = vpop.f32.mrf.mxu2 }
  0xc0   : > { %v439_v42 = vadd.f32 %v438_v3, %v410_v30  ;;  %v326_v51 = vadd.f32 %v982_v7, %v325_v4 }
  0xc1   : > { %v245_v6 = vpop.f32.mrf.mxu0 }
  0xc2   : > { %v246_v27 = vadd.f32 %v982_v7, %v245_v6  ;;  %v355_v2 = vadd.f32 %v977_v56, %v326_v51 }
  0xc4   : > { %v275_v39 = vadd.f32 %v274_v58, %v246_v27  ;;  %v243_v58 = vadd.f32 %v982_v7, %v242_v1  ;;  %v362_v12 = vmax.f32 %v355_v2, 0.0 }
  0xc5   : > { %v412_v5 = vpop.f32.mrf.mxu1 }
  0xc6   : > { %v280_v54 = vmax.f32 %v275_v39, 0.0  ;;  %v413_v60 = vadd.f32 %v982_v7, %v412_v5 }
  0xc7   : > { %v984_v8 = vpop.f32.mrf.mxu3 }
  0xc8   : > { %v328_v9 = vpop.f32.mrf.mxu2  ;;  %v442_v1 = vadd.f32 %v984_v8, %v413_v60 }
  0xc9   : > { %v329_v20 = vadd.f32 %v982_v7, %v328_v9  ;;  %v272_v9 = vadd.f32 %v975_v55, %v243_v58 }
  0xca   : > { %v449_v56 = vmax.f32 %v442_v1, 0.0 }
  0xcb   : > { %v358_v32 = vadd.f32 %v357_v59, %v329_v20  ;;  %v448_v59 = vmax.f32 %v439_v42, 0.0 }
  0xcd   : > { %v415_v14 = vpop.f32.mrf.mxu1  ;;  %v363_v46 = vmax.f32 %v358_v32, 0.0 }
  0xce   : > { %v489_v15 = vpop.f32.mrf.mxu0  ;;  %v416_v21 = vadd.f32 %v982_v7, %v415_v14  ;;  %v279_v14 = vmax.f32 %v272_v9, 0.0 }
  0xcf   : > { %v490_v18 = vadd.f32 %v982_v7, %v489_v15  ;;  %v444_v19 = vpop.f32.mrf.mxu3  ;;  %v367_v62 = vmax.f32 %v280_v54, %v363_v46 }
  0xd0   : > { %v518_v22 = vpop.f32.mrf.mxu2  ;;  %v445_v33 = vadd.f32 %v444_v19, %v416_v21  ;;  %v366_v16 = vmax.f32 %v279_v14, %v362_v12 }
  0xd1   : > { %v519_v25 = vadd.f32 %v518_v22, %v490_v18 }
  0xd2   : > { %v450_v47 = vmax.f32 %v445_v33, 0.0 }
  0xd3   : > { %v530_v31 = vmax.f32 %v519_v25, 0.0 }
  0xd5   : > { %v534_v36 = vmax.f32 %v447_v29, %v530_v31  ;;  %v498_v37 = vpop.f32.mrf.mxu1 }
  0xd6   : > { %v499_v40 = vadd.f32 %v982_v7, %v498_v37  ;;  %v492_v41 = vpop.f32.mrf.mxu0 }
  0xd7   : > { %v538_v43 = vmax.f32 %v364_v34, %v534_v36  ;;  %v493_v44 = vadd.f32 %v982_v7, %v492_v41  ;;  %v527_v45 = vpop.f32.mrf.mxu3 }
  0xd8   : > { %v528_v48 = vadd.f32 %v527_v45, %v499_v40  ;;  %v521_v49 = vpop.f32.mrf.mxu2 }
  0xd9   : > { %543 = vst.msk [vmem:[%s1000_s9] sm:$0xff] %vm542_vm2, %v538_v43  ;;  %v522_v52 = vadd.f32 %v521_v49, %v493_v44 }
  0xda   : > { %v533_v57 = vmax.f32 %v528_v48, 0.0 }
  0xdb   : > { %v531_v61 = vmax.f32 %v522_v52, 0.0 }
  0xdc   : > { %v537_v63 = vmax.f32 %v450_v47, %v533_v57 }
  0xdd   : > { %v535_v3 = vmax.f32 %v448_v59, %v531_v61 }
  0xde   : > { %v541_v4 = vmax.f32 %v367_v62, %v537_v63  ;;  %v495_v6 = vpop.f32.mrf.mxu0 }
  0xdf   : > { %v539_v10 = vmax.f32 %v365_v0, %v535_v3  ;;  %v496_v11 = vadd.f32 %v982_v7, %v495_v6 }
  0xe0   : > { %547 = vst.msk [vmem:[%s1000_s9 + $0x18] sm:$0x1] %vm546_vm3, %v541_v4  ;;  %v524_v5 = vpop.f32.mrf.mxu2 }
  0xe1   : > { %544 = vst.msk [vmem:[%s1000_s9 + $0x8] sm:$0xff] %vm542_vm2, %v539_v10  ;;  %v525_v13 = vadd.f32 %v524_v5, %v496_v11 }
  0xe3   : > { %v532_v15 = vmax.f32 %v525_v13, 0.0 }
  0xe5   : > { %v536_v17 = vmax.f32 %v449_v56, %v532_v15 }
  0xe7   : > { %v540_v18 = vmax.f32 %v366_v16, %v536_v17 }
  0xe9   : > { %545 = vst.msk [vmem:[%s1000_s9 + $0x10] sm:$0xff] %vm542_vm2, %v540_v18 }
  0xea PF: > { %s13_s12 = sadd.s32 1, %s694_s12  }
  0xeb   : > { %p10_p4 = scmp.ge.s32.totalorder %s13_s12, 4  }
  0xed   :  { %12 = sbr.rel (!%p10_p4) target bundleno = 1 (0x1), region = 65 }

// kernel: net_forward.5
= control target key start
LH: loop header
LB: loop body
LE: loop exit
PB: predicated region body
PF: predicated region fallthrough
CT: control target
= control target key end

     0   :  { %s598_s0 = inlined_call_operand.vmem [shape: f32[2,400], index: 0, kind: input, shape index: {}]   ;;  %s599_s1 = inlined_call_operand.vmem [shape: f32[400,120], index: 1, kind: input, shape index: {}]   ;;  %s600_s2 = inlined_call_operand.vmem [shape: f32[1,120], index: 2, kind: input, shape index: {}]   ;;  %s601_s3 = inlined_call_operand.vmem [shape: f32[120,84], index: 3, kind: input, shape index: {}]   ;;  %s602_s4 = inlined_call_operand.vmem [shape: f32[1,84], index: 4, kind: input, shape index: {}]   ;;  %s603_s5 = inlined_call_operand.vmem [shape: f32[84,10], index: 5, kind: input, shape index: {}]   ;;  %s604_s6 = inlined_call_operand.vmem [shape: f32[1,10], index: 6, kind: input, shape index: {}]   ;;  %s605_s7 = inlined_call_operand.hbm [shape: f32[2,10], index: 7, kind: output, shape index: {}]  }
   0x1   :  { %v75_v0 = vld [vmem:[%s599_s1 + $0x178] sm:$0xff]  ;;  %v74_v2 = vld [vmem:[%s599_s1 + $0x170] sm:$0xff]  ;;  %v73_v5 = vld [vmem:[%s599_s1 + $0x168] sm:$0xff] }
   0x2   :  { %v43_v1 = vld [vmem:[%s599_s1 + $0x78] sm:$0xff]  ;;  %134 = vmatpush.msra.mxu2 %v75_v0  ;;  %v42_v3 = vld [vmem:[%s599_s1 + $0x70] sm:$0xff]  ;;  %v41_v6 = vld [vmem:[%s599_s1 + $0x68] sm:$0xff] }
   0x3   :  { %94 = vmatpush.msra.mxu0 %v43_v1  ;;  %v59_v4 = vld [vmem:[%s599_s1 + $0xf8] sm:$0xff]  ;;  %v58_v7 = vld [vmem:[%s599_s1 + $0xf0] sm:$0xff]  ;;  %v57_v8 = vld [vmem:[%s599_s1 + $0xe8] sm:$0xff] }
   0x4   :  { %114 = vmatpush.msra.mxu1 %v59_v4  ;;  %135 = vmatpush.msra.mxu2 %v74_v2  ;;  %v72_v9 = vld [vmem:[%s599_s1 + $0x160] sm:$0xff]  ;;  %v71_v12 = vld [vmem:[%s599_s1 + $0x158] sm:$0xff]  ;;  %v70_v15 = vld [vmem:[%s599_s1 + $0x150] sm:$0xff] }
   0x5   :  { %95 = vmatpush.msra.mxu0 %v42_v3  ;;  %v40_v10 = vld [vmem:[%s599_s1 + $0x60] sm:$0xff]  ;;  %v39_v13 = vld [vmem:[%s599_s1 + $0x58] sm:$0xff]  ;;  %v38_v16 = vld [vmem:[%s599_s1 + $0x50] sm:$0xff] }
   0x6   :  { %115 = vmatpush.msra.mxu1 %v58_v7  ;;  %136 = vmatpush.msra.mxu2 %v73_v5  ;;  %v56_v11 = vld [vmem:[%s599_s1 + $0xe0] sm:$0xff]  ;;  %v55_v14 = vld [vmem:[%s599_s1 + $0xd8] sm:$0xff]  ;;  %v54_v17 = vld [vmem:[%s599_s1 + $0xd0] sm:$0xff] }
   0x7   :  { %96 = vmatpush.msra.mxu0 %v41_v6  ;;  %v69_v18 = vld [vmem:[%s599_s1 + $0x148] sm:$0xff]  ;;  %v68_v21 = vld [vmem:[%s599_s1 + $0x140] sm:$0xff]  ;;  %v67_v24 = vld [vmem:[%s599_s1 + $0x138] sm:$0xff] }
   0x8   :  { %116 = vmatpush.msra.mxu1 %v57_v8  ;;  %137 = vmatpush.msra.mxu2 %v72_v9  ;;  %v37_v19 = vld [vmem:[%s599_s1 + $0x48] sm:$0xff]  ;;  %v36_v22 = vld [vmem:[%s599_s1 + $0x40] sm:$0xff]  ;;  %v35_v25 = vld [vmem:[%s599_s1 + $0x38] sm:$0xff] }
   0x9   :  { %97 = vmatpush.msra.mxu0 %v40_v10  ;;  %v53_v20 = vld [vmem:[%s599_s1 + $0xc8] sm:$0xff]  ;;  %v52_v23 = vld [vmem:[%s599_s1 + $0xc0] sm:$0xff]  ;;  %v51_v26 = vld [vmem:[%s599_s1 + $0xb8] sm:$0xff] }
   0xa   :  { %117 = vmatpush.msra.mxu1 %v56_v11  ;;  %138 = vmatpush.msra.mxu2 %v71_v12  ;;  %v77_v27 = vld [vmem:[%s599_s1 + $0x188] sm:$0xff]  ;;  %v27_v28 = vld [vmem:[%s598_s0] sm:$0xff]  ;;  %v66_v29 = vld [vmem:[%s599_s1 + $0x130] sm:$0xff] }
   0xb   :  { %98 = vmatpush.msra.mxu0 %v39_v13  ;;  %v34_v30 = vld [vmem:[%s599_s1 + $0x30] sm:$0xff]  ;;  %168 = vmatpush.msra.mxu3 %v77_v27  ;;  %83 = vst [vmem:[#allocation1] ss:$4 sm:$0xff] %v27_v28  ;;  %v76_v31 = vld [vmem:[%s599_s1 + $0x180] sm:$0xff]  ;;  %v65_v34 = vld [vmem:[%s599_s1 + $0x128] sm:$0xff] }
   0xc   :  { %118 = vmatpush.msra.mxu1 %v55_v14  ;;  %139 = vmatpush.msra.mxu2 %v70_v15  ;;  %v50_v32 = vld [vmem:[%s599_s1 + $0xb0] sm:$0xff]  ;;  %v33_v35 = vld [vmem:[%s599_s1 + $0x28] sm:$0xff]  ;;  %v64_v36 = vld [vmem:[%s599_s1 + $0x120] sm:$0xff] }
   0xd   :  { %99 = vmatpush.msra.mxu0 %v38_v16  ;;  %v189_v33 = vld [vmem:[%s601_s3 + $0x70] sm:$0xff]  ;;  %169 = vmatpush.msra.mxu3 %v76_v31  ;;  %v32_v37 = vld [vmem:[%s599_s1 + $0x20] sm:$0xff]  ;;  %v49_v38 = vld [vmem:[%s599_s1 + $0xa8] sm:$0xff] }
   0xe   :  { %119 = vmatpush.msra.mxu1 %v54_v17  ;;  %140 = vmatpush.msra.mxu2 %v69_v18  ;;  %v188_v39 = vld [vmem:[%s601_s3 + $0x68] sm:$0xff]  ;;  %v48_v40 = vld [vmem:[%s599_s1 + $0xa0] sm:$0xff] }
   0xf   :  { %100 = vmatpush.msra.mxu0 %v37_v19  ;;  %199 = vmatpush.msrb.mxu3 %v189_v33  ;;  %v187_v41 = vld [vmem:[%s601_s3 + $0x60] sm:$0xff] }
  0x10   :  { %120 = vmatpush.msra.mxu1 %v53_v20  ;;  %141 = vmatpush.msra.mxu2 %v68_v21 }
  0x11   :  { %101 = vmatpush.msra.mxu0 %v36_v22 }
  0x12   :  { %121 = vmatpush.msra.mxu1 %v52_v23  ;;  %142 = vmatpush.msra.mxu2 %v67_v24 }
  0x13   :  { %102 = vmatpush.msra.mxu0 %v35_v25 }
  0x14   :  { %122 = vmatpush.msra.mxu1 %v51_v26  ;;  %143 = vmatpush.msra.mxu2 %v66_v29 }
  0x15   :  { %103 = vmatpush.msra.mxu0 %v34_v30 }
  0x16   :  { %123 = vmatpush.msra.mxu1 %v50_v32  ;;  %144 = vmatpush.msra.mxu2 %v65_v34 }
  0x17   :  { %104 = vmatpush.msra.mxu0 %v33_v35 }
  0x18   :  { %12 = vsyncpa [#allocation3], 0  ;;  %124 = vmatpush.msra.mxu1 %v49_v38  ;;  %v63_v42 = vld [vmem:[%s599_s1 + $0x118] sm:$0xff]  ;;  %200 = vmatpush.msrb.mxu3 %v188_v39  ;;  %vm91_vm0 = vcmask 130048   ;;  %v62_v45 = vld [vmem:[%s599_s1 + $0x110] sm:$0xff]  ;;  %vm238_vm1 = vcmask 1043456  }
  0x19   :  { %v31_v43 = vld [vmem:[%s599_s1 + $0x18] sm:$0xff]  ;;  %145 = vmatpush.msra.mxu2 %v64_v36  ;;  %105 = vmatpush.msra.mxu0 %v32_v37  ;;  %v30_v46 = vld [vmem:[%s599_s1 + $0x10] sm:$0xff]  ;;  %v61_v50 = vld [vmem:[%s599_s1 + $0x108] sm:$0xff]  ;;  %vm194_vm2 = vcmask 982016   ;;  %vm234_vm3 = vcmask 687104   ;;  %s314_s15 = smov [#allocation2]  }
  0x1a   :  { %v47_v44 = vld [vmem:[%s599_s1 + $0x98] sm:$0xff]  ;;  %125 = vmatpush.msra.mxu1 %v48_v40  ;;  %201 = vmatpush.msrb.mxu3 %v187_v41  ;;  %v46_v48 = vld [vmem:[%s599_s1 + $0x90] sm:$0xff]  ;;  %v29_v51 = vld [vmem:[%s599_s1 + $0x8] sm:$0xff]  ;;  %s269_s16 = sshll.u32 %s314_s15, 4  ;;  %vm262_vm4 = vcmask 74752   ;;  %s270_s16 = int_to_ptr.vmem [resolvable:$true] %s269_s16 }
  0x1b   :  { %v87_v47 = vld.sshfl [vmem:[#allocation1 + $0x18] sm:$0xff pattern:$0x73625140]  ;;  %146 = vmatpush.msra.mxu2 %v63_v42  ;;  %106 = vmatpush.msra.mxu0 %v31_v43  ;;  %v45_v52 = vld [vmem:[%s599_s1 + $0x88] sm:$0xff]  ;;  %v185_v53 = vld [vmem:[%s601_s3 + $0x50] sm:$0xff] }
  0x1c   :  { %v186_v49 = vld [vmem:[%s601_s3 + $0x58] sm:$0xff]  ;;  %126 = vmatpush.msra.mxu1 %v47_v44  ;;  %280 = vmatmul.msk.f32.vlgmr.msra.gmra.mxu3 %vm91_vm0, %v87_v47  ;;  %v60_v54 = vld [vmem:[%s599_s1 + $0x100] sm:$0xff]  ;;  %v86_v56 = vld.sshfl [vmem:[#allocation1 + $0x10] sm:$0xff pattern:$0x73625140] }
  0x1d   :  { %147 = vmatpush.msra.mxu2 %v62_v45  ;;  %107 = vmatpush.msra.mxu0 %v30_v46  ;;  %v28_v55 = vld [vmem:[%s599_s1] sm:$0xff]  ;;  %v184_v59 = vld [vmem:[%s601_s3 + $0x48] sm:$0xff]  ;;  %v182_v62 = vld [vmem:[%s601_s3 + $0x38] sm:$0xff] }
  0x1e   :  { %127 = vmatpush.msra.mxu1 %v46_v48  ;;  %202 = vmatpush.msrb.mxu3 %v186_v49  ;;  %v84_v57 = vld.sshfl [vmem:[#allocation1] sm:$0xff pattern:$0x73625140]  ;;  %v85_v60 = vld.sshfl [vmem:[#allocation1 + $0x8] sm:$0xff pattern:$0x73625140] }
  0x1f   :  { %148 = vmatpush.msra.mxu2 %v61_v50  ;;  %108 = vmatpush.msra.mxu0 %v29_v51  ;;  %v44_v58 = vld [vmem:[%s599_s1 + $0x80] sm:$0xff]  ;;  %v181_v63 = vld [vmem:[%s601_s3 + $0x30] sm:$0xff]  ;;  %v180_v0 = vld [vmem:[%s601_s3 + $0x28] sm:$0xff] }
  0x20   :  { %128 = vmatpush.msra.mxu1 %v45_v52  ;;  %203 = vmatpush.msrb.mxu3 %v185_v53  ;;  %v183_v61 = vld [vmem:[%s601_s3 + $0x40] sm:$0xff]  ;;  %v178_v2 = vld [vmem:[%s601_s3 + $0x18] sm:$0xff]  ;;  %v177_v3 = vld [vmem:[%s601_s3 + $0x10] sm:$0xff] }
  0x21   :  { %149 = vmatpush.msra.mxu2 %v60_v54  ;;  %109 = vmatpush.msra.mxu0 %v28_v55  ;;  %v179_v1 = vld [vmem:[%s601_s3 + $0x20] sm:$0xff]  ;;  %v176_v4 = vld [vmem:[%s601_s3 + $0x8] sm:$0xff]  ;;  %v229_v6 = vld [vmem:[%s603_s5 + $0x50] sm:$0xf] }
  0x22   :  { %150 = vmatmul.f32.vlgmr.msra.gmra.mxu2 %v86_v56  ;;  %110 = vmatmul.f32.vlgmr.msra.gmra.mxu0 %v84_v57  ;;  %v175_v5 = vld [vmem:[%s601_s3] sm:$0xff]  ;;  %v228_v7 = vld [vmem:[%s603_s5 + $0x48] sm:$0xff]  ;;  %v226_v9 = vld [vmem:[%s603_s5 + $0x38] sm:$0xff] }
  0x23   :  { %129 = vmatpush.msra.mxu1 %v44_v58  ;;  %204 = vmatpush.msrb.mxu3 %v184_v59  ;;  %v227_v8 = vld [vmem:[%s603_s5 + $0x40] sm:$0xff]  ;;  %v225_v10 = vld [vmem:[%s603_s5 + $0x30] sm:$0xff]  ;;  %v224_v11 = vld [vmem:[%s603_s5 + $0x28] sm:$0xff] }
  0x24   :  { %130 = vmatmul.f32.vlgmr.msra.gmra.mxu1 %v85_v60  ;;  %282 = vmatpush.msk.msrb.mxu0 %vm238_vm1, %v229_v6  ;;  %v223_v12 = vld [vmem:[%s603_s5 + $0x20] sm:$0xff]  ;;  %v222_v13 = vld [vmem:[%s603_s5 + $0x18] sm:$0xff]  ;;  %v221_v24 = vld [vmem:[%s603_s5 + $0x10] sm:$0xff] }
  0x25   :  { %205 = vmatpush.msrb.mxu3 %v183_v61  ;;  %v285_v14 = vld [vmem:[%s600_s2] ss:$0 sm:$0xff]  ;;  %v220_v25 = vld [vmem:[%s603_s5 + $0x8] sm:$0xff] }
  0x26   :  { %248 = vmatpush.msrb.mxu0 %v228_v7  ;;  %v219_v26 = vld [vmem:[%s603_s5] sm:$0xff]  ;;  %s271_s5 = sshll.u32 %s605_s7, 4  ;;  %s272_s5 = int_to_ptr.hbm [resolvable:$true] %s271_s5 }
  0x27   :  { %206 = vmatpush.msrb.mxu3 %v182_v62  ;;  %v286_v27 = vld [vmem:[%s602_s4] ss:$0 sm:$0xff] }
  0x28   :  { %249 = vmatpush.msrb.mxu0 %v227_v8  ;;  %v287_v31 = vld [vmem:[%s604_s6] ss:$0 sm:$0xff] }
  0x29   :  { %207 = vmatpush.msrb.mxu3 %v181_v63 }
  0x2a   :  { %250 = vmatpush.msrb.mxu0 %v226_v9 }
  0x2b   :  { %208 = vmatpush.msrb.mxu3 %v180_v0 }
  0x2c   :  { %251 = vmatpush.msrb.mxu0 %v225_v10 }
  0x2d   :  { %209 = vmatpush.msrb.mxu3 %v179_v1 }
  0x2e   :  { %252 = vmatpush.msrb.mxu0 %v224_v11 }
  0x2f   :  { %210 = vmatpush.msrb.mxu3 %v178_v2 }
  0x30   :  { %253 = vmatpush.msrb.mxu0 %v223_v12 }
  0x31   :  { %211 = vmatpush.msrb.mxu3 %v177_v3 }
  0x32   :  { %254 = vmatpush.msrb.mxu0 %v222_v13 }
  0x33   :  { %212 = vmatpush.msrb.mxu3 %v176_v4 }
  0x34   :  { %255 = vmatpush.msrb.mxu0 %v221_v24 }
  0x35   :  { %213 = vmatpush.msrb.mxu3 %v175_v5 }
  0x36   :  { %256 = vmatpush.msrb.mxu0 %v220_v25 }
  0x38   :  { %257 = vmatpush.msrb.mxu0 %v219_v26 }
  0x9f   :  { %v111_v15 = vpop.f32.mrf.mxu0  ;;  %v171_v20 = vpop.f32.mrf.mxu3 }
  0xa0   :  { %v112_v16 = vadd.f32 %v285_v14, %v111_v15 }
  0xa1   :  { %v131_v17 = vpop.f32.mrf.mxu1 }
  0xa2   :  { %v132_v18 = vadd.f32 %v131_v17, %v112_v16 }
  0xa5   :  { %v151_v19 = vpop.f32.mrf.mxu2 }
  0xa6   :  { %v152_v21 = vadd.f32 %v151_v19, %v132_v18 }
  0xa8   :  { %v172_v22 = vadd.f32 %v171_v20, %v152_v21 }
  0xaa   :  { %v174_v23 = vmax.f32 %v172_v22, 0.0 }
  0xac   :  { %281 = vmatmul.msk.f32.vlgmr.msrb.gmra.mxu3 %vm194_vm2, %v174_v23 }
 0x12f   :  { %v215_v28 = vpop.f32.mrf.mxu3 }
 0x130   :  { %v216_v29 = vadd.f32 %v286_v27, %v215_v28 }
 0x132   :  { %v218_v30 = vmax.f32 %v216_v29, 0.0 }
 0x134   :  { %283 = vmatmul.msk.f32.vlgmr.msrb.gmra.mxu0 %vm234_vm3, %v218_v30 }
 0x1b1   :  { %v259_v32 = vpop.f32.mrf.mxu0 }
 0x1b2   :  { %v260_v33 = vadd.f32 %v287_v31, %v259_v32 }
 0x1b4   :  { %263 = vst.msk [vmem:[#allocation2] sm:$0x3] %vm262_vm4, %v260_v33 }
 0x1b5   :  { %274 = dma.vmem_to_hbm [thread:$0]  %s270_s16, 32, %s272_s5, [#allocation3]  }
 0x1b6   :  { %312 = dma.done.wait [#allocation3], 32  }
 0x1b7   :  { %313 = vsyncadd [#allocation3], 4294967264 }
 0x1b8   :  { %279 = vsyncpa [#allocation3], 1 }

</bundles_post_ra>
